<compile_context>
chip_gen: v6e
topology: v6e:2x2x1
jax: 0.10.0
libtpu: 0.0.40
codegen_flags: <defaults>
</compile_context>

<pallas_src>
import jax
import jax.numpy as jnp
from jax import lax
from jax.experimental import pallas as pl
from jax.experimental.pallas import tpu as pltpu


# ---------------------------------------------------------------------------
# Single-buffering probe for resident (constant index_map) operands.
# ---------------------------------------------------------------------------
_RESIDENT_SPEC_KWARGS = None


def _resident_spec_kwargs():
    """kwargs that single-buffer a constant-index resident operand.

    pipeline_mode=pl.Buffered(1) halves the VMEM footprint of weights whose
    index_map never changes (the default pipeline double-buffers every input).
    Probed once so the script degrades gracefully if unsupported."""
    global _RESIDENT_SPEC_KWARGS
    if _RESIDENT_SPEC_KWARGS is not None:
        return _RESIDENT_SPEC_KWARGS
    try:
        kw = {"pipeline_mode": pl.Buffered(1)}

        def _probe(x_ref, o_ref):
            o_ref[...] = x_ref[...] + 1.0

        fn = pl.pallas_call(
            _probe,
            out_shape=jax.ShapeDtypeStruct((8, 128), jnp.float32),
            grid=(2,),
            in_specs=[pl.BlockSpec((8, 128), lambda i: (0, 0), **kw)],
            out_specs=pl.BlockSpec((8, 128), lambda i: (0, 0)),
        )
        jax.block_until_ready(fn(jnp.zeros((8, 128), jnp.float32)))
        _RESIDENT_SPEC_KWARGS = kw
    except Exception:  # pipeline_mode not available -> fall back to default buffering
        _RESIDENT_SPEC_KWARGS = {}
    return _RESIDENT_SPEC_KWARGS


# ---------------------------------------------------------------------------
# Kernel 1 (fused): input projection + bidirectional serial recurrence.
#   Grid: (NB,) sequential ("arbitrary"); each step = one block of Tt timesteps.
#   xf/xb      : (Tt*Bp, nIn) bf16  — x block in forward / reversed block order
#   wif/wib    : (nIn, 4H)  bf16    — input weights (resident, single-buffered)
#   bf/bb      : (1, 4H)    f32     — folded b_ih + b_hh (resident)
#   whhf/whhb  : (H, 4H)    bf16    — recurrent weights (resident)
#   outf/outb  : (Tt*Bp, H) bf16    — hidden outputs, written in forward-time order
#   gf/gb      : VMEM (Tt*Bp, 4H) f32 gate scratch;  hf/cf/hb/cb: VMEM (Bp, H) f32 state
#   Gate columns are packed (i, f, o, g).
# ---------------------------------------------------------------------------
def fused_bilstm_kernel(xf_ref, xb_ref, wif_ref, wib_ref, bf_ref, bb_ref,
                        whhf_ref, whhb_ref, outf_ref, outb_ref,
                        gf, gb, hf, cf, hb, cb):
    Bp, H = hf.shape
    n_steps = xf_ref.shape[0] // Bp

    @pl.when(pl.program_id(0) == 0)
    def _():
        hf[...] = jnp.zeros_like(hf)
        cf[...] = jnp.zeros_like(cf)
        hb[...] = jnp.zeros_like(hb)
        cb[...] = jnp.zeros_like(cb)

    # Fused input projection for this time block (bf16 MXU, f32 accumulate),
    # biases folded in.  No HBM gate tensor.
    gf[...] = (jnp.dot(xf_ref[...], wif_ref[...],
                       preferred_element_type=jnp.float32) + bf_ref[...])
    gb[...] = (jnp.dot(xb_ref[...], wib_ref[...],
                       preferred_element_type=jnp.float32) + bb_ref[...])

    def cell(g_pre, h_ref, c_ref, whh_ref):
        gates = g_pre + jnp.dot(h_ref[...].astype(whh_ref.dtype), whh_ref[...],
                                preferred_element_type=jnp.float32)
        # packed gate order (i, f, o, g): one wide sigmoid + one tanh
        s = jax.nn.sigmoid(gates[:, :3 * H])
        i_g = s[:, 0 * H:1 * H]
        f_g = s[:, 1 * H:2 * H]
        o_g = s[:, 2 * H:3 * H]
        g_g = jnp.tanh(gates[:, 3 * H:])
        c = f_g * c_ref[...] + i_g * g_g
        h = o_g * jnp.tanh(c)
        c_ref[...] = c
        h_ref[...] = h
        return h

    def body(j, carry):
        # Bp is a multiple of 8 (batch padded in the wrapper) -> aligned starts.
        rf = pl.multiple_of(j * Bp, 8)                   # forward: local time j
        rb = pl.multiple_of((n_steps - 1 - j) * Bp, 8)   # backward: descending time
        h_f = cell(gf[pl.ds(rf, Bp), :], hf, cf, whhf_ref)
        h_b = cell(gb[pl.ds(rb, Bp), :], hb, cb, whhb_ref)
        outf_ref[pl.ds(rf, Bp), :] = h_f.astype(outf_ref.dtype)
        outb_ref[pl.ds(rb, Bp), :] = h_b.astype(outb_ref.dtype)
        return carry

    # Partial unroll: keeps LLO scheduling visibility at bounded vreg pressure.
    lax.fori_loop(0, n_steps, body, None, unroll=min(8, n_steps))


# ---------------------------------------------------------------------------
# Kernel 2: embedding Linear; bidirectional concat folded into split weights:
#   out = H_f @ W_emb[:H] + H_b @ W_emb[H:] + b_emb   (output lane-padded to 128n)
# ---------------------------------------------------------------------------
def linear_kernel(hf_ref, hb_ref, w1_ref, w2_ref, b_ref, o_ref):
    o_ref[...] = (
        jnp.dot(hf_ref[...], w1_ref[...], preferred_element_type=jnp.float32)
        + jnp.dot(hb_ref[...], w2_ref[...], preferred_element_type=jnp.float32)
        + b_ref[...]
    ).astype(o_ref.dtype)


# ---------------------------------------------------------------------------
# Tiling helpers
# ---------------------------------------------------------------------------
def _largest_divisor_leq(n, target, multiple=1):
    """Largest divisor of n that is <= target and a multiple of `multiple`;
    falls back to n (single full-extent block)."""
    best, found = n, False
    for c in range(1, n + 1):
        if n % c == 0 and c <= target and c % multiple == 0:
            best, found = c, True
    return best if found else n


# ---------------------------------------------------------------------------
# Wrapper
# ---------------------------------------------------------------------------
def bidirectional_lstm(x, p, *, time_block=None):
    """x: (T, B, nIn) float32 (time-major, like nn.LSTM) -> (T, B, nOut) float32."""
    T, B, nIn = x.shape
    H = p["whh_f"].shape[0]
    nOut_pad = p["w_emb_f"].shape[1]
    nOut = p["n_out"]

    # Pad batch to a multiple of 8: keeps every dynamic pl.ds start sublane-aligned.
    B_pad = ((B + 7) // 8) * 8
    if B_pad != B:
        x = jnp.pad(x, ((0, 0), (0, B_pad - B), (0, 0)))

    # ---- VMEM-budget-aware tile sizes -------------------------------------
    if time_block is None:
        # approx VMEM bytes per recurrence row: f32 gate scratch (both dirs) +
        # double-buffered bf16 x blocks + double-buffered bf16 out blocks.
        per_row = 32 * H + 8 * nIn + 8 * H
        target_rows = max(B_pad, min(1024, (8 * 2**20) // max(per_row, 1)))
        time_block = _largest_divisor_leq(T, max(1, target_rows // B_pad))
    Tt = time_block
    assert T % Tt == 0, "time_block must divide T"
    NB = T // Tt
    rec_rows = Tt * B_pad

    lin_row_bytes = 4 * (2 * H) + 2 * (nOut_pad * 4)  # bf16 inputs (x2 buf) + f32 out (x2 buf)
    lin_rows = _largest_divisor_leq(
        T * B_pad, max(8, min(1024, (8 * 2**20) // max(lin_row_bytes, 1))), multiple=8)
    n_lin = (T * B_pad) // lin_rows

    # ---- explicit VMEM limit: >= 32 MiB (v5e default is 16), <= 64 MiB (v7x) ----
    rec_vmem = (2 * 2 * rec_rows * nIn * 2 + 2 * nIn * 4 * H * 2 + 2 * H * 4 * H * 2
                + 2 * 4 * H * 4 + 2 * 2 * rec_rows * H * 2
                + 2 * rec_rows * 4 * H * 4 + 4 * B_pad * H * 4)
    lin_vmem = (2 * 2 * lin_rows * H * 2 + 2 * H * nOut_pad * 2 + nOut_pad * 4
                + 2 * lin_rows * nOut_pad * 4)
    vmem_limit = int(min(64 * 2**20, max(32 * 2**20, 2 * max(rec_vmem, lin_vmem))))

    kw = _resident_spec_kwargs()

    # Time-major flatten (T, B_pad, nIn) -> (T*B_pad, nIn); bf16 feeds the MXU and
    # halves the streamed HBM traffic.  The same array is streamed twice (forward
    # and reversed block order) purely via index_maps.
    x2 = x.reshape(T * B_pad, nIn).astype(jnp.bfloat16)

    # ---- 1) fused input projection + serial bidirectional recurrence -------
    out_f, out_b = pl.pallas_call(
        fused_bilstm_kernel,
        out_shape=(jax.ShapeDtypeStruct((T * B_pad, H), jnp.bfloat16),
                   jax.ShapeDtypeStruct((T * B_pad, H), jnp.bfloat16)),
        grid=(NB,),
        in_specs=[
            pl.BlockSpec((rec_rows, nIn), lambda i: (i, 0)),             # x, fwd order
            pl.BlockSpec((rec_rows, nIn), lambda i: (NB - 1 - i, 0)),    # x, reversed blocks
            pl.BlockSpec((nIn, 4 * H), lambda i: (0, 0), **kw),          # W_in fwd (resident)
            pl.BlockSpec((nIn, 4 * H), lambda i: (0, 0), **kw),          # W_in bwd
            pl.BlockSpec((1, 4 * H), lambda i: (0, 0), **kw),            # bias fwd
            pl.BlockSpec((1, 4 * H), lambda i: (0, 0), **kw),            # bias bwd
            pl.BlockSpec((H, 4 * H), lambda i: (0, 0), **kw),            # W_hh fwd
            pl.BlockSpec((H, 4 * H), lambda i: (0, 0), **kw),            # W_hh bwd
        ],
        out_specs=[
            pl.BlockSpec((rec_rows, H), lambda i: (i, 0)),               # fwd hidden
            pl.BlockSpec((rec_rows, H), lambda i: (NB - 1 - i, 0)),      # bwd hidden
        ],
        scratch_shapes=[
            pltpu.VMEM((rec_rows, 4 * H), jnp.float32),   # gate scratch fwd
            pltpu.VMEM((rec_rows, 4 * H), jnp.float32),   # gate scratch bwd
            pltpu.VMEM((B_pad, H), jnp.float32),          # h fwd
            pltpu.VMEM((B_pad, H), jnp.float32),          # c fwd
            pltpu.VMEM((B_pad, H), jnp.float32),          # h bwd
            pltpu.VMEM((B_pad, H), jnp.float32),          # c bwd
        ],
        compiler_params=pltpu.CompilerParams(
            dimension_semantics=("arbitrary",),           # strictly sequential (state carry)
            vmem_limit_bytes=vmem_limit),
    )(x2, x2, p["w_in_f"], p["w_in_b"], p["b_f"], p["b_b"], p["whh_f"], p["whh_b"])

    # ---- 2) embedding Linear (lane-dense padded output) ---------------------
    emb = pl.pallas_call(
        linear_kernel,
        out_shape=jax.ShapeDtypeStruct((T * B_pad, nOut_pad), jnp.float32),
        grid=(n_lin,),
        in_specs=[
            pl.BlockSpec((lin_rows, H), lambda i: (i, 0)),
            pl.BlockSpec((lin_rows, H), lambda i: (i, 0)),
            pl.BlockSpec((H, nOut_pad), lambda i: (0, 0), **kw),
            pl.BlockSpec((H, nOut_pad), lambda i: (0, 0), **kw),
            pl.BlockSpec((1, nOut_pad), lambda i: (0, 0), **kw),
        ],
        out_specs=pl.BlockSpec((lin_rows, nOut_pad), lambda i: (i, 0)),
        compiler_params=pltpu.CompilerParams(
            dimension_semantics=("parallel",),
            vmem_limit_bytes=vmem_limit),
    )(out_f, out_b, p["w_emb_f"], p["w_emb_b"], p["b_emb"])

    # Slice off lane padding (nOut) and batch padding (B).
    return emb[:, :nOut].reshape(T, B_pad, nOut)[:, :B, :]


# ---------------------------------------------------------------------------
# Parameters
# ---------------------------------------------------------------------------
def init_params(key, nIn, nHidden, nOut):
    """Raw PyTorch-style params (uniform(-1/sqrt(fan), 1/sqrt(fan)), gate order i,f,g,o)."""
    H = nHidden
    k = 1.0 / float(H) ** 0.5
    k_emb = 1.0 / float(2 * H) ** 0.5
    keys = jax.random.split(key, 10)

    def u(k_, shape, s):
        return jax.random.uniform(k_, shape, jnp.float32, -s, s)

    return {
        "wih_f": u(keys[0], (nIn, 4 * H), k),     # weight_ih_l0^T
        "whh_f": u(keys[1], (H, 4 * H), k),       # weight_hh_l0^T
        "bih_f": u(keys[2], (1, 4 * H), k),
        "bhh_f": u(keys[3], (1, 4 * H), k),
        "wih_b": u(keys[4], (nIn, 4 * H), k),     # reverse direction
        "whh_b": u(keys[5], (H, 4 * H), k),
        "bih_b": u(keys[6], (1, 4 * H), k),
        "bhh_b": u(keys[7], (1, 4 * H), k),
        "w_emb": u(keys[8], (2 * H, nOut), k_emb),  # Linear weight^T
        "b_emb": u(keys[9], (1, nOut), k_emb),
    }


def pack_params(raw):
    """Kernel-side packing: gate columns reordered (i,f,g,o)->(i,f,o,g), biases folded,
    bf16 matmul operands, embedding weights split and lane-padded to 128n columns."""
    H = raw["whh_f"].shape[0]
    nOut = raw["w_emb"].shape[1]
    nOut_pad = ((nOut + 127) // 128) * 128

    def reorder(w):  # (..., 4H) columns i,f,g,o -> i,f,o,g
        return jnp.concatenate([w[..., :2 * H], w[..., 3 * H:4 * H], w[..., 2 * H:3 * H]],
                               axis=-1)

    def pad_cols(w, n):
        return jnp.pad(w, ((0, 0), (0, n - w.shape[1])))

    return {
        "w_in_f": reorder(raw["wih_f"]).astype(jnp.bfloat16),
        "w_in_b": reorder(raw["wih_b"]).astype(jnp.bfloat16),
        "b_f": reorder(raw["bih_f"] + raw["bhh_f"]).astype(jnp.float32),
        "b_b": reorder(raw["bih_b"] + raw["bhh_b"]).astype(jnp.float32),
        "whh_f": reorder(raw["whh_f"]).astype(jnp.bfloat16),
        "whh_b": reorder(raw["whh_b"]).astype(jnp.bfloat16),
        "w_emb_f": pad_cols(raw["w_emb"][:H], nOut_pad).astype(jnp.bfloat16),
        "w_emb_b": pad_cols(raw["w_emb"][H:], nOut_pad).astype(jnp.bfloat16),
        "b_emb": pad_cols(raw["b_emb"], nOut_pad).astype(jnp.float32),
        "n_out": nOut,
    }


# ---------------------------------------------------------------------------
# Pure-JAX reference (PyTorch bidirectional LSTM + Linear semantics, f32 HIGHEST)
# ---------------------------------------------------------------------------
def reference_forward(x, raw):
    T, B, _ = x.shape
    H = raw["whh_f"].shape[0]
    hp = lax.Precision.HIGHEST

    def make_step(wih, whh, b):
        def step(carry, xt):
            h, c = carry
            g = jnp.dot(xt, wih, precision=hp) + jnp.dot(h, whh, precision=hp) + b
            i = jax.nn.sigmoid(g[:, :H])
            f = jax.nn.sigmoid(g[:, H:2 * H])
            gg = jnp.tanh(g[:, 2 * H:3 * H])
            o = jax.nn.sigmoid(g[:, 3 * H:])
            c = f * c + i * gg
            h = o * jnp.tanh(c)
            return (h, c), h
        return step

    z = jnp.zeros((B, H), jnp.float32)
    bf = raw["bih_f"] + raw["bhh_f"]
    bb = raw["bih_b"] + raw["bhh_b"]
    _, hs_f = lax.scan(make_step(raw["wih_f"], raw["whh_f"], bf), (z, z), x)
    _, hs_b_rev = lax.scan(make_step(raw["wih_b"], raw["whh_b"], bb), (z, z), x[::-1])
    hs_b = hs_b_rev[::-1]
    rec = jnp.concatenate([hs_f, hs_b], axis=-1).reshape(T * B, 2 * H)
    out = jnp.dot(rec, raw["w_emb"], precision=hp) + raw["b_emb"]
    return out.reshape(T, B, -1)


if __name__ == "__main__":
    T, B, nIn, nHidden, nOut = 8, 2, 32, 32, 16

    key = jax.random.PRNGKey(0)
    k_x, k_p = jax.random.split(key)
    x = jax.random.normal(k_x, (T, B, nIn), jnp.float32)
    raw = init_params(k_p, nIn, nHidden, nOut)
    packed = pack_params(raw)

    # time_block=4 -> 2 sequential grid steps: exercises the cross-block h/c state
    # carry and the time-reversed backward index_maps.
    out = bidirectional_lstm(x, packed, time_block=4)
    jax.block_until_ready(out)
    assert out.shape == (T, B, nOut), out.shape

    ref = reference_forward(x, raw)
    max_err = float(jnp.max(jnp.abs(out - ref)))
    # bf16 MXU operands (f32 accumulation, f32 cell state) => looser tolerance
    # than a pure-f32 pipeline.
    assert max_err < 5e-2, f"max abs err vs reference: {max_err}"
    print("KERNEL_OK")
</pallas_src>

<mosaic_0001>
module attributes {stable_mosaic.version = 11 : i64} {
  func.func @_probe(%arg0: i32, %arg1: memref<8x128xf32, #tpu.memory_space<vmem>>, %arg2: memref<8x128xf32, #tpu.memory_space<vmem>>) attributes {dimension_semantics = [#tpu.dimension_semantics<arbitrary>], iteration_bounds = array<i64: 2>, scalar_prefetch = 0 : i64, scratch_operands = 0 : i64, tpu.core_type = #tpu.core_type<tc>, window_params = [{pipeline_mode = #tpu.pipeline_mode<synchronous>, transform_indices = @transform_0, window_bounds = array<i64: 8, 128>}, {pipeline_mode = #tpu.pipeline_mode<synchronous>, transform_indices = @transform_1, window_bounds = array<i64: 8, 128>}]} {
    %c0 = arith.constant 0 : index
    %c0_0 = arith.constant 0 : index
    %0 = vector.load %arg1[%c0, %c0_0] : memref<8x128xf32, #tpu.memory_space<vmem>>, vector<8x128xf32>
    %cst = arith.constant 1.000000e+00 : f32
    %1 = vector.broadcast %cst : f32 to vector<8x128xf32>
    %2 = arith.addf %0, %1 : vector<8x128xf32>
    %c0_1 = arith.constant 0 : index
    %c0_2 = arith.constant 0 : index
    %3 = vector.load %arg2[%c0_1, %c0_2] : memref<8x128xf32, #tpu.memory_space<vmem>>, vector<8x128xf32>
    tpu.vector_store %arg2[%c0_1, %c0_2], %2 {strides = array<i32>} : memref<8x128xf32, #tpu.memory_space<vmem>>, vector<8x128xf32>,
    return
  }
  func.func @transform_0(%arg0: i32) -> (i32, i32) {
    %c0_i32 = arith.constant 0 : i32
    %c0_i32_0 = arith.constant 0 : i32
    %c0_i32_1 = arith.constant 0 : i32
    return %c0_i32, %c0_i32_0 : i32, i32
  }
  func.func @transform_1(%arg0: i32) -> (i32, i32) {
    %c0_i32 = arith.constant 0 : i32
    %c0_i32_0 = arith.constant 0 : i32
    %c0_i32_1 = arith.constant 0 : i32
    return %c0_i32, %c0_i32_0 : i32, i32
  }
}

module attributes {stable_mosaic.version = 11 : i64} {
  func.func @fused_bilstm_kernel(%arg0: i32, %arg1: memref<32x32xbf16, #tpu.memory_space<vmem>>, %arg2: memref<32x32xbf16, #tpu.memory_space<vmem>>, %arg3: memref<32x128xbf16, #tpu.memory_space<vmem>>, %arg4: memref<32x128xbf16, #tpu.memory_space<vmem>>, %arg5: memref<1x128xf32, #tpu.memory_space<vmem>>, %arg6: memref<1x128xf32, #tpu.memory_space<vmem>>, %arg7: memref<32x128xbf16, #tpu.memory_space<vmem>>, %arg8: memref<32x128xbf16, #tpu.memory_space<vmem>>, %arg9: memref<32x32xbf16, #tpu.memory_space<vmem>>, %arg10: memref<32x32xbf16, #tpu.memory_space<vmem>>, %arg11: memref<32x128xf32, #tpu.memory_space<vmem>>, %arg12: memref<32x128xf32, #tpu.memory_space<vmem>>, %arg13: memref<8x32xf32, #tpu.memory_space<vmem>>, %arg14: memref<8x32xf32, #tpu.memory_space<vmem>>, %arg15: memref<8x32xf32, #tpu.memory_space<vmem>>, %arg16: memref<8x32xf32, #tpu.memory_space<vmem>>) attributes {dimension_semantics = [#tpu.dimension_semantics<arbitrary>], iteration_bounds = array<i64: 2>, scalar_prefetch = 0 : i64, scratch_operands = 6 : i64, tpu.core_type = #tpu.core_type<tc>, window_params = [{transform_indices = @transform_0, window_bounds = array<i64: 32, 32>}, {transform_indices = @transform_1, window_bounds = array<i64: 32, 32>}, {pipeline_mode = #tpu.pipeline_mode<synchronous>, transform_indices = @transform_2, window_bounds = array<i64: 32, 128>}, {pipeline_mode = #tpu.pipeline_mode<synchronous>, transform_indices = @transform_3, window_bounds = array<i64: 32, 128>}, {pipeline_mode = #tpu.pipeline_mode<synchronous>, transform_indices = @transform_4, window_bounds = array<i64: 1, 128>}, {pipeline_mode = #tpu.pipeline_mode<synchronous>, transform_indices = @transform_5, window_bounds = array<i64: 1, 128>}, {pipeline_mode = #tpu.pipeline_mode<synchronous>, transform_indices = @transform_6, window_bounds = array<i64: 32, 128>}, {pipeline_mode = #tpu.pipeline_mode<synchronous>, transform_indices = @transform_7, window_bounds = array<i64: 32, 128>}, {transform_indices = @transform_8, window_bounds = array<i64: 32, 32>}, {transform_indices = @transform_9, window_bounds = array<i64: 32, 32>}]} {
    %c0_i32 = arith.constant 0 : i32
    %0 = arith.cmpi eq, %arg0, %c0_i32 : i32
    %1 = arith.extui %0 : i1 to i32
    %c0_i32_0 = arith.constant 0 : i32
    %2 = arith.cmpi ne, %1, %c0_i32_0 : i32
    scf.if %2 {
      %cst_141 = arith.constant 0.000000e+00 : f32
      %269 = vector.broadcast %cst_141 : f32 to vector<8x32xf32>
      %c0_142 = arith.constant 0 : index
      %c0_143 = arith.constant 0 : index
      %270 = vector.load %arg13[%c0_142, %c0_143] : memref<8x32xf32, #tpu.memory_space<vmem>>, vector<8x32xf32>
      tpu.vector_store %arg13[%c0_142, %c0_143], %269 {strides = array<i32>} : memref<8x32xf32, #tpu.memory_space<vmem>>, vector<8x32xf32>,
      %cst_144 = arith.constant 0.000000e+00 : f32
      %271 = vector.broadcast %cst_144 : f32 to vector<8x32xf32>
      %c0_145 = arith.constant 0 : index
      %c0_146 = arith.constant 0 : index
      %272 = vector.load %arg14[%c0_145, %c0_146] : memref<8x32xf32, #tpu.memory_space<vmem>>, vector<8x32xf32>
      tpu.vector_store %arg14[%c0_145, %c0_146], %271 {strides = array<i32>} : memref<8x32xf32, #tpu.memory_space<vmem>>, vector<8x32xf32>,
      %cst_147 = arith.constant 0.000000e+00 : f32
      %273 = vector.broadcast %cst_147 : f32 to vector<8x32xf32>
      %c0_148 = arith.constant 0 : index
      %c0_149 = arith.constant 0 : index
      %274 = vector.load %arg15[%c0_148, %c0_149] : memref<8x32xf32, #tpu.memory_space<vmem>>, vector<8x32xf32>
      tpu.vector_store %arg15[%c0_148, %c0_149], %273 {strides = array<i32>} : memref<8x32xf32, #tpu.memory_space<vmem>>, vector<8x32xf32>,
      %cst_150 = arith.constant 0.000000e+00 : f32
      %275 = vector.broadcast %cst_150 : f32 to vector<8x32xf32>
      %c0_151 = arith.constant 0 : index
      %c0_152 = arith.constant 0 : index
      %276 = vector.load %arg16[%c0_151, %c0_152] : memref<8x32xf32, #tpu.memory_space<vmem>>, vector<8x32xf32>
      tpu.vector_store %arg16[%c0_151, %c0_152], %275 {strides = array<i32>} : memref<8x32xf32, #tpu.memory_space<vmem>>, vector<8x32xf32>,
    } else {
    }
    %c0 = arith.constant 0 : index
    %c0_1 = arith.constant 0 : index
    %3 = vector.load %arg1[%c0, %c0_1] : memref<32x32xbf16, #tpu.memory_space<vmem>>, vector<32x32xbf16>
    %c0_2 = arith.constant 0 : index
    %c0_3 = arith.constant 0 : index
    %4 = vector.load %arg3[%c0_2, %c0_3] : memref<32x128xbf16, #tpu.memory_space<vmem>>, vector<32x128xbf16>
    %cst = arith.constant dense<0.000000e+00> : vector<32x128xf32>
    %5 = tpu.matmul %3, %4, %cst {dimension_numbers = #tpu.dot_dimension_numbers<[1], [0], [0], [1], [0, 0, 1, 1], [], []>} : vector<32x32xbf16>, vector<32x128xbf16>, vector<32x128xf32> -> vector<32x128xf32>
    %c0_4 = arith.constant 0 : index
    %c0_5 = arith.constant 0 : index
    %6 = vector.load %arg5[%c0_4, %c0_5] : memref<1x128xf32, #tpu.memory_space<vmem>>, vector<1x128xf32>
    %7 = vector.broadcast %6 : vector<1x128xf32> to vector<32x128xf32>
    %8 = arith.addf %5, %7 : vector<32x128xf32>
    %c0_6 = arith.constant 0 : index
    %c0_7 = arith.constant 0 : index
    %9 = vector.load %arg11[%c0_6, %c0_7] : memref<32x128xf32, #tpu.memory_space<vmem>>, vector<32x128xf32>
    tpu.vector_store %arg11[%c0_6, %c0_7], %8 {strides = array<i32>} : memref<32x128xf32, #tpu.memory_space<vmem>>, vector<32x128xf32>,
    %c0_8 = arith.constant 0 : index
    %c0_9 = arith.constant 0 : index
    %10 = vector.load %arg2[%c0_8, %c0_9] : memref<32x32xbf16, #tpu.memory_space<vmem>>, vector<32x32xbf16>
    %c0_10 = arith.constant 0 : index
    %c0_11 = arith.constant 0 : index
    %11 = vector.load %arg4[%c0_10, %c0_11] : memref<32x128xbf16, #tpu.memory_space<vmem>>, vector<32x128xbf16>
    %cst_12 = arith.constant dense<0.000000e+00> : vector<32x128xf32>
    %12 = tpu.matmul %10, %11, %cst_12 {dimension_numbers = #tpu.dot_dimension_numbers<[1], [0], [0], [1], [0, 0, 1, 1], [], []>} : vector<32x32xbf16>, vector<32x128xbf16>, vector<32x128xf32> -> vector<32x128xf32>
    %c0_13 = arith.constant 0 : index
    %c0_14 = arith.constant 0 : index
    %13 = vector.load %arg6[%c0_13, %c0_14] : memref<1x128xf32, #tpu.memory_space<vmem>>, vector<1x128xf32>
    %14 = vector.broadcast %13 : vector<1x128xf32> to vector<32x128xf32>
    %15 = arith.addf %12, %14 : vector<32x128xf32>
    %c0_15 = arith.constant 0 : index
    %c0_16 = arith.constant 0 : index
    %16 = vector.load %arg12[%c0_15, %c0_16] : memref<32x128xf32, #tpu.memory_space<vmem>>, vector<32x128xf32>
    tpu.vector_store %arg12[%c0_15, %c0_16], %15 {strides = array<i32>} : memref<32x128xf32, #tpu.memory_space<vmem>>, vector<32x128xf32>,
    %c0_i32_17 = arith.constant 0 : i32
    %c8_i32 = arith.constant 8 : i32
    %17 = arith.muli %c0_i32_17, %c8_i32 : i32
    %18 = tpu.assume_multiple %17, 8 : i32
    %c3_i32 = arith.constant 3 : i32
    %19 = arith.subi %c3_i32, %c0_i32_17 : i32
    %c8_i32_18 = arith.constant 8 : i32
    %20 = arith.muli %19, %c8_i32_18 : i32
    %21 = tpu.assume_multiple %20, 8 : i32
    %22 = arith.index_cast %18 : i32 to index
    %c0_19 = arith.constant 0 : index
    %23 = vector.load %arg11[%22, %c0_19] : memref<32x128xf32, #tpu.memory_space<vmem>>, vector<8x128xf32>
    %c0_20 = arith.constant 0 : index
    %c0_21 = arith.constant 0 : index
    %24 = vector.load %arg13[%c0_20, %c0_21] : memref<8x32xf32, #tpu.memory_space<vmem>>, vector<8x32xf32>
    %25 = arith.truncf %24 : vector<8x32xf32> to vector<8x32xbf16>
    %c0_22 = arith.constant 0 : index
    %c0_23 = arith.constant 0 : index
    %26 = vector.load %arg7[%c0_22, %c0_23] : memref<32x128xbf16, #tpu.memory_space<vmem>>, vector<32x128xbf16>
    %cst_24 = arith.constant dense<0.000000e+00> : vector<8x128xf32>
    %27 = tpu.matmul %25, %26, %cst_24 {dimension_numbers = #tpu.dot_dimension_numbers<[1], [0], [0], [1], [0, 0, 1, 1], [], []>} : vector<8x32xbf16>, vector<32x128xbf16>, vector<8x128xf32> -> vector<8x128xf32>
    %28 = arith.addf %23, %27 : vector<8x128xf32>
    %29 = vector.extract_strided_slice %28 {offsets = [0, 0], sizes = [8, 96], strides = [1, 1]} : vector<8x128xf32> to vector<8x96xf32>
    %30 = arith.negf %29 : vector<8x96xf32>
    %31 = math.exp %30 : vector<8x96xf32>
    %cst_25 = arith.constant 1.000000e+00 : f32
    %32 = vector.broadcast %cst_25 : f32 to vector<8x96xf32>
    %33 = arith.addf %32, %31 : vector<8x96xf32>
    %34 = arith.divf %32, %33 : vector<8x96xf32>
    %35 = vector.extract_strided_slice %34 {offsets = [0, 0], sizes = [8, 32], strides = [1, 1]} : vector<8x96xf32> to vector<8x32xf32>
    %36 = vector.extract_strided_slice %34 {offsets = [0, 32], sizes = [8, 32], strides = [1, 1]} : vector<8x96xf32> to vector<8x32xf32>
    %37 = vector.extract_strided_slice %34 {offsets = [0, 64], sizes = [8, 32], strides = [1, 1]} : vector<8x96xf32> to vector<8x32xf32>
    %38 = vector.extract_strided_slice %28 {offsets = [0, 96], sizes = [8, 32], strides = [1, 1]} : vector<8x128xf32> to vector<8x32xf32>
    %39 = math.tanh %38 : vector<8x32xf32>
    %c0_26 = arith.constant 0 : index
    %c0_27 = arith.constant 0 : index
    %40 = vector.load %arg14[%c0_26, %c0_27] : memref<8x32xf32, #tpu.memory_space<vmem>>, vector<8x32xf32>
    %41 = arith.mulf %36, %40 : vector<8x32xf32>
    %42 = arith.mulf %35, %39 : vector<8x32xf32>
    %43 = arith.addf %41, %42 : vector<8x32xf32>
    %44 = math.tanh %43 : vector<8x32xf32>
    %45 = arith.mulf %37, %44 : vector<8x32xf32>
    %c0_28 = arith.constant 0 : index
    %c0_29 = arith.constant 0 : index
    %46 = vector.load %arg14[%c0_28, %c0_29] : memref<8x32xf32, #tpu.memory_space<vmem>>, vector<8x32xf32>
    tpu.vector_store %arg14[%c0_28, %c0_29], %43 {strides = array<i32>} : memref<8x32xf32, #tpu.memory_space<vmem>>, vector<8x32xf32>,
    %c0_30 = arith.constant 0 : index
    %c0_31 = arith.constant 0 : index
    %47 = vector.load %arg13[%c0_30, %c0_31] : memref<8x32xf32, #tpu.memory_space<vmem>>, vector<8x32xf32>
    tpu.vector_store %arg13[%c0_30, %c0_31], %45 {strides = array<i32>} : memref<8x32xf32, #tpu.memory_space<vmem>>, vector<8x32xf32>,
    %48 = arith.index_cast %21 : i32 to index
    %c0_32 = arith.constant 0 : index
    %49 = vector.load %arg12[%48, %c0_32] : memref<32x128xf32, #tpu.memory_space<vmem>>, vector<8x128xf32>
    %c0_33 = arith.constant 0 : index
    %c0_34 = arith.constant 0 : index
    %50 = vector.load %arg15[%c0_33, %c0_34] : memref<8x32xf32, #tpu.memory_space<vmem>>, vector<8x32xf32>
    %51 = arith.truncf %50 : vector<8x32xf32> to vector<8x32xbf16>
    %c0_35 = arith.constant 0 : index
    %c0_36 = arith.constant 0 : index
    %52 = vector.load %arg8[%c0_35, %c0_36] : memref<32x128xbf16, #tpu.memory_space<vmem>>, vector<32x128xbf16>
    %cst_37 = arith.constant dense<0.000000e+00> : vector<8x128xf32>
    %53 = tpu.matmul %51, %52, %cst_37 {dimension_numbers = #tpu.dot_dimension_numbers<[1], [0], [0], [1], [0, 0, 1, 1], [], []>} : vector<8x32xbf16>, vector<32x128xbf16>, vector<8x128xf32> -> vector<8x128xf32>
    %54 = arith.addf %49, %53 : vector<8x128xf32>
    %55 = vector.extract_strided_slice %54 {offsets = [0, 0], sizes = [8, 96], strides = [1, 1]} : vector<8x128xf32> to vector<8x96xf32>
    %56 = arith.negf %55 : vector<8x96xf32>
    %57 = math.exp %56 : vector<8x96xf32>
    %cst_38 = arith.constant 1.000000e+00 : f32
    %58 = vector.broadcast %cst_38 : f32 to vector<8x96xf32>
    %59 = arith.addf %58, %57 : vector<8x96xf32>
    %60 = arith.divf %58, %59 : vector<8x96xf32>
    %61 = vector.extract_strided_slice %60 {offsets = [0, 0], sizes = [8, 32], strides = [1, 1]} : vector<8x96xf32> to vector<8x32xf32>
    %62 = vector.extract_strided_slice %60 {offsets = [0, 32], sizes = [8, 32], strides = [1, 1]} : vector<8x96xf32> to vector<8x32xf32>
    %63 = vector.extract_strided_slice %60 {offsets = [0, 64], sizes = [8, 32], strides = [1, 1]} : vector<8x96xf32> to vector<8x32xf32>
    %64 = vector.extract_strided_slice %54 {offsets = [0, 96], sizes = [8, 32], strides = [1, 1]} : vector<8x128xf32> to vector<8x32xf32>
    %65 = math.tanh %64 : vector<8x32xf32>
    %c0_39 = arith.constant 0 : index
    %c0_40 = arith.constant 0 : index
    %66 = vector.load %arg16[%c0_39, %c0_40] : memref<8x32xf32, #tpu.memory_space<vmem>>, vector<8x32xf32>
    %67 = arith.mulf %62, %66 : vector<8x32xf32>
    %68 = arith.mulf %61, %65 : vector<8x32xf32>
    %69 = arith.addf %67, %68 : vector<8x32xf32>
    %70 = math.tanh %69 : vector<8x32xf32>
    %71 = arith.mulf %63, %70 : vector<8x32xf32>
    %c0_41 = arith.constant 0 : index
    %c0_42 = arith.constant 0 : index
    %72 = vector.load %arg16[%c0_41, %c0_42] : memref<8x32xf32, #tpu.memory_space<vmem>>, vector<8x32xf32>
    tpu.vector_store %arg16[%c0_41, %c0_42], %69 {strides = array<i32>} : memref<8x32xf32, #tpu.memory_space<vmem>>, vector<8x32xf32>,
    %c0_43 = arith.constant 0 : index
    %c0_44 = arith.constant 0 : index
    %73 = vector.load %arg15[%c0_43, %c0_44] : memref<8x32xf32, #tpu.memory_space<vmem>>, vector<8x32xf32>
    tpu.vector_store %arg15[%c0_43, %c0_44], %71 {strides = array<i32>} : memref<8x32xf32, #tpu.memory_space<vmem>>, vector<8x32xf32>,
    %74 = arith.truncf %45 : vector<8x32xf32> to vector<8x32xbf16>
    %75 = arith.index_cast %18 : i32 to index
    %c0_45 = arith.constant 0 : index
    %76 = vector.load %arg9[%75, %c0_45] : memref<32x32xbf16, #tpu.memory_space<vmem>>, vector<8x32xbf16>
    tpu.vector_store %arg9[%75, %c0_45], %74 {strides = array<i32>} : memref<32x32xbf16, #tpu.memory_space<vmem>>, vector<8x32xbf16>,
    %77 = arith.truncf %71 : vector<8x32xf32> to vector<8x32xbf16>
    %78 = arith.index_cast %21 : i32 to index
    %c0_46 = arith.constant 0 : index
    %79 = vector.load %arg10[%78, %c0_46] : memref<32x32xbf16, #tpu.memory_space<vmem>>, vector<8x32xbf16>
    tpu.vector_store %arg10[%78, %c0_46], %77 {strides = array<i32>} : memref<32x32xbf16, #tpu.memory_space<vmem>>, vector<8x32xbf16>,
    %c1_i32 = arith.constant 1 : i32
    %c8_i32_47 = arith.constant 8 : i32
    %80 = arith.muli %c1_i32, %c8_i32_47 : i32
    %81 = tpu.assume_multiple %80, 8 : i32
    %c3_i32_48 = arith.constant 3 : i32
    %82 = arith.subi %c3_i32_48, %c1_i32 : i32
    %c8_i32_49 = arith.constant 8 : i32
    %83 = arith.muli %82, %c8_i32_49 : i32
    %84 = tpu.assume_multiple %83, 8 : i32
    %85 = arith.index_cast %81 : i32 to index
    %c0_50 = arith.constant 0 : index
    %86 = vector.load %arg11[%85, %c0_50] : memref<32x128xf32, #tpu.memory_space<vmem>>, vector<8x128xf32>
    %c0_51 = arith.constant 0 : index
    %c0_52 = arith.constant 0 : index
    %87 = vector.load %arg13[%c0_51, %c0_52] : memref<8x32xf32, #tpu.memory_space<vmem>>, vector<8x32xf32>
    %88 = arith.truncf %87 : vector<8x32xf32> to vector<8x32xbf16>
    %c0_53 = arith.constant 0 : index
    %c0_54 = arith.constant 0 : index
    %89 = vector.load %arg7[%c0_53, %c0_54] : memref<32x128xbf16, #tpu.memory_space<vmem>>, vector<32x128xbf16>
    %cst_55 = arith.constant dense<0.000000e+00> : vector<8x128xf32>
    %90 = tpu.matmul %88, %89, %cst_55 {dimension_numbers = #tpu.dot_dimension_numbers<[1], [0], [0], [1], [0, 0, 1, 1], [], []>} : vector<8x32xbf16>, vector<32x128xbf16>, vector<8x128xf32> -> vector<8x128xf32>
    %91 = arith.addf %86, %90 : vector<8x128xf32>
    %92 = vector.extract_strided_slice %91 {offsets = [0, 0], sizes = [8, 96], strides = [1, 1]} : vector<8x128xf32> to vector<8x96xf32>
    %93 = arith.negf %92 : vector<8x96xf32>
    %94 = math.exp %93 : vector<8x96xf32>
    %cst_56 = arith.constant 1.000000e+00 : f32
    %95 = vector.broadcast %cst_56 : f32 to vector<8x96xf32>
    %96 = arith.addf %95, %94 : vector<8x96xf32>
    %97 = arith.divf %95, %96 : vector<8x96xf32>
    %98 = vector.extract_strided_slice %97 {offsets = [0, 0], sizes = [8, 32], strides = [1, 1]} : vector<8x96xf32> to vector<8x32xf32>
    %99 = vector.extract_strided_slice %97 {offsets = [0, 32], sizes = [8, 32], strides = [1, 1]} : vector<8x96xf32> to vector<8x32xf32>
    %100 = vector.extract_strided_slice %97 {offsets = [0, 64], sizes = [8, 32], strides = [1, 1]} : vector<8x96xf32> to vector<8x32xf32>
    %101 = vector.extract_strided_slice %91 {offsets = [0, 96], sizes = [8, 32], strides = [1, 1]} : vector<8x128xf32> to vector<8x32xf32>
    %102 = math.tanh %101 : vector<8x32xf32>
    %c0_57 = arith.constant 0 : index
    %c0_58 = arith.constant 0 : index
    %103 = vector.load %arg14[%c0_57, %c0_58] : memref<8x32xf32, #tpu.memory_space<vmem>>, vector<8x32xf32>
    %104 = arith.mulf %99, %103 : vector<8x32xf32>
    %105 = arith.mulf %98, %102 : vector<8x32xf32>
    %106 = arith.addf %104, %105 : vector<8x32xf32>
    %107 = math.tanh %106 : vector<8x32xf32>
    %108 = arith.mulf %100, %107 : vector<8x32xf32>
    %c0_59 = arith.constant 0 : index
    %c0_60 = arith.constant 0 : index
    %109 = vector.load %arg14[%c0_59, %c0_60] : memref<8x32xf32, #tpu.memory_space<vmem>>, vector<8x32xf32>
    tpu.vector_store %arg14[%c0_59, %c0_60], %106 {strides = array<i32>} : memref<8x32xf32, #tpu.memory_space<vmem>>, vector<8x32xf32>,
    %c0_61 = arith.constant 0 : index
    %c0_62 = arith.constant 0 : index
    %110 = vector.load %arg13[%c0_61, %c0_62] : memref<8x32xf32, #tpu.memory_space<vmem>>, vector<8x32xf32>
    tpu.vector_store %arg13[%c0_61, %c0_62], %108 {strides = array<i32>} : memref<8x32xf32, #tpu.memory_space<vmem>>, vector<8x32xf32>,
    %111 = arith.index_cast %84 : i32 to index
    %c0_63 = arith.constant 0 : index
    %112 = vector.load %arg12[%111, %c0_63] : memref<32x128xf32, #tpu.memory_space<vmem>>, vector<8x128xf32>
    %c0_64 = arith.constant 0 : index
    %c0_65 = arith.constant 0 : index
    %113 = vector.load %arg15[%c0_64, %c0_65] : memref<8x32xf32, #tpu.memory_space<vmem>>, vector<8x32xf32>
    %114 = arith.truncf %113 : vector<8x32xf32> to vector<8x32xbf16>
    %c0_66 = arith.constant 0 : index
    %c0_67 = arith.constant 0 : index
    %115 = vector.load %arg8[%c0_66, %c0_67] : memref<32x128xbf16, #tpu.memory_space<vmem>>, vector<32x128xbf16>
    %cst_68 = arith.constant dense<0.000000e+00> : vector<8x128xf32>
    %116 = tpu.matmul %114, %115, %cst_68 {dimension_numbers = #tpu.dot_dimension_numbers<[1], [0], [0], [1], [0, 0, 1, 1], [], []>} : vector<8x32xbf16>, vector<32x128xbf16>, vector<8x128xf32> -> vector<8x128xf32>
    %117 = arith.addf %112, %116 : vector<8x128xf32>
    %118 = vector.extract_strided_slice %117 {offsets = [0, 0], sizes = [8, 96], strides = [1, 1]} : vector<8x128xf32> to vector<8x96xf32>
    %119 = arith.negf %118 : vector<8x96xf32>
    %120 = math.exp %119 : vector<8x96xf32>
    %cst_69 = arith.constant 1.000000e+00 : f32
    %121 = vector.broadcast %cst_69 : f32 to vector<8x96xf32>
    %122 = arith.addf %121, %120 : vector<8x96xf32>
    %123 = arith.divf %121, %122 : vector<8x96xf32>
    %124 = vector.extract_strided_slice %123 {offsets = [0, 0], sizes = [8, 32], strides = [1, 1]} : vector<8x96xf32> to vector<8x32xf32>
    %125 = vector.extract_strided_slice %123 {offsets = [0, 32], sizes = [8, 32], strides = [1, 1]} : vector<8x96xf32> to vector<8x32xf32>
    %126 = vector.extract_strided_slice %123 {offsets = [0, 64], sizes = [8, 32], strides = [1, 1]} : vector<8x96xf32> to vector<8x32xf32>
    %127 = vector.extract_strided_slice %117 {offsets = [0, 96], sizes = [8, 32], strides = [1, 1]} : vector<8x128xf32> to vector<8x32xf32>
    %128 = math.tanh %127 : vector<8x32xf32>
    %c0_70 = arith.constant 0 : index
    %c0_71 = arith.constant 0 : index
    %129 = vector.load %arg16[%c0_70, %c0_71] : memref<8x32xf32, #tpu.memory_space<vmem>>, vector<8x32xf32>
    %130 = arith.mulf %125, %129 : vector<8x32xf32>
    %131 = arith.mulf %124, %128 : vector<8x32xf32>
    %132 = arith.addf %130, %131 : vector<8x32xf32>
    %133 = math.tanh %132 : vector<8x32xf32>
    %134 = arith.mulf %126, %133 : vector<8x32xf32>
    %c0_72 = arith.constant 0 : index
    %c0_73 = arith.constant 0 : index
    %135 = vector.load %arg16[%c0_72, %c0_73] : memref<8x32xf32, #tpu.memory_space<vmem>>, vector<8x32xf32>
    tpu.vector_store %arg16[%c0_72, %c0_73], %132 {strides = array<i32>} : memref<8x32xf32, #tpu.memory_space<vmem>>, vector<8x32xf32>,
    %c0_74 = arith.constant 0 : index
    %c0_75 = arith.constant 0 : index
    %136 = vector.load %arg15[%c0_74, %c0_75] : memref<8x32xf32, #tpu.memory_space<vmem>>, vector<8x32xf32>
    tpu.vector_store %arg15[%c0_74, %c0_75], %134 {strides = array<i32>} : memref<8x32xf32, #tpu.memory_space<vmem>>, vector<8x32xf32>,
    %137 = arith.truncf %108 : vector<8x32xf32> to vector<8x32xbf16>
    %138 = arith.index_cast %81 : i32 to index
    %c0_76 = arith.constant 0 : index
    %139 = vector.load %arg9[%138, %c0_76] : memref<32x32xbf16, #tpu.memory_space<vmem>>, vector<8x32xbf16>
    tpu.vector_store %arg9[%138, %c0_76], %137 {strides = array<i32>} : memref<32x32xbf16, #tpu.memory_space<vmem>>, vector<8x32xbf16>,
    %140 = arith.truncf %134 : vector<8x32xf32> to vector<8x32xbf16>
    %141 = arith.index_cast %84 : i32 to index
    %c0_77 = arith.constant 0 : index
    %142 = vector.load %arg10[%141, %c0_77] : memref<32x32xbf16, #tpu.memory_space<vmem>>, vector<8x32xbf16>
    tpu.vector_store %arg10[%141, %c0_77], %140 {strides = array<i32>} : memref<32x32xbf16, #tpu.memory_space<vmem>>, vector<8x32xbf16>,
    %c2_i32 = arith.constant 2 : i32
    %c8_i32_78 = arith.constant 8 : i32
    %143 = arith.muli %c2_i32, %c8_i32_78 : i32
    %144 = tpu.assume_multiple %143, 8 : i32
    %c3_i32_79 = arith.constant 3 : i32
    %145 = arith.subi %c3_i32_79, %c2_i32 : i32
    %c8_i32_80 = arith.constant 8 : i32
    %146 = arith.muli %145, %c8_i32_80 : i32
    %147 = tpu.assume_multiple %146, 8 : i32
    %148 = arith.index_cast %144 : i32 to index
    %c0_81 = arith.constant 0 : index
    %149 = vector.load %arg11[%148, %c0_81] : memref<32x128xf32, #tpu.memory_space<vmem>>, vector<8x128xf32>
    %c0_82 = arith.constant 0 : index
    %c0_83 = arith.constant 0 : index
    %150 = vector.load %arg13[%c0_82, %c0_83] : memref<8x32xf32, #tpu.memory_space<vmem>>, vector<8x32xf32>
    %151 = arith.truncf %150 : vector<8x32xf32> to vector<8x32xbf16>
    %c0_84 = arith.constant 0 : index
    %c0_85 = arith.constant 0 : index
    %152 = vector.load %arg7[%c0_84, %c0_85] : memref<32x128xbf16, #tpu.memory_space<vmem>>, vector<32x128xbf16>
    %cst_86 = arith.constant dense<0.000000e+00> : vector<8x128xf32>
    %153 = tpu.matmul %151, %152, %cst_86 {dimension_numbers = #tpu.dot_dimension_numbers<[1], [0], [0], [1], [0, 0, 1, 1], [], []>} : vector<8x32xbf16>, vector<32x128xbf16>, vector<8x128xf32> -> vector<8x128xf32>
    %154 = arith.addf %149, %153 : vector<8x128xf32>
    %155 = vector.extract_strided_slice %154 {offsets = [0, 0], sizes = [8, 96], strides = [1, 1]} : vector<8x128xf32> to vector<8x96xf32>
    %156 = arith.negf %155 : vector<8x96xf32>
    %157 = math.exp %156 : vector<8x96xf32>
    %cst_87 = arith.constant 1.000000e+00 : f32
    %158 = vector.broadcast %cst_87 : f32 to vector<8x96xf32>
    %159 = arith.addf %158, %157 : vector<8x96xf32>
    %160 = arith.divf %158, %159 : vector<8x96xf32>
    %161 = vector.extract_strided_slice %160 {offsets = [0, 0], sizes = [8, 32], strides = [1, 1]} : vector<8x96xf32> to vector<8x32xf32>
    %162 = vector.extract_strided_slice %160 {offsets = [0, 32], sizes = [8, 32], strides = [1, 1]} : vector<8x96xf32> to vector<8x32xf32>
    %163 = vector.extract_strided_slice %160 {offsets = [0, 64], sizes = [8, 32], strides = [1, 1]} : vector<8x96xf32> to vector<8x32xf32>
    %164 = vector.extract_strided_slice %154 {offsets = [0, 96], sizes = [8, 32], strides = [1, 1]} : vector<8x128xf32> to vector<8x32xf32>
    %165 = math.tanh %164 : vector<8x32xf32>
    %c0_88 = arith.constant 0 : index
    %c0_89 = arith.constant 0 : index
    %166 = vector.load %arg14[%c0_88, %c0_89] : memref<8x32xf32, #tpu.memory_space<vmem>>, vector<8x32xf32>
    %167 = arith.mulf %162, %166 : vector<8x32xf32>
    %168 = arith.mulf %161, %165 : vector<8x32xf32>
    %169 = arith.addf %167, %168 : vector<8x32xf32>
    %170 = math.tanh %169 : vector<8x32xf32>
    %171 = arith.mulf %163, %170 : vector<8x32xf32>
    %c0_90 = arith.constant 0 : index
    %c0_91 = arith.constant 0 : index
    %172 = vector.load %arg14[%c0_90, %c0_91] : memref<8x32xf32, #tpu.memory_space<vmem>>, vector<8x32xf32>
    tpu.vector_store %arg14[%c0_90, %c0_91], %169 {strides = array<i32>} : memref<8x32xf32, #tpu.memory_space<vmem>>, vector<8x32xf32>,
    %c0_92 = arith.constant 0 : index
    %c0_93 = arith.constant 0 : index
    %173 = vector.load %arg13[%c0_92, %c0_93] : memref<8x32xf32, #tpu.memory_space<vmem>>, vector<8x32xf32>
    tpu.vector_store %arg13[%c0_92, %c0_93], %171 {strides = array<i32>} : memref<8x32xf32, #tpu.memory_space<vmem>>, vector<8x32xf32>,
    %174 = arith.index_cast %147 : i32 to index
    %c0_94 = arith.constant 0 : index
    %175 = vector.load %arg12[%174, %c0_94] : memref<32x128xf32, #tpu.memory_space<vmem>>, vector<8x128xf32>
    %c0_95 = arith.constant 0 : index
    %c0_96 = arith.constant 0 : index
    %176 = vector.load %arg15[%c0_95, %c0_96] : memref<8x32xf32, #tpu.memory_space<vmem>>, vector<8x32xf32>
    %177 = arith.truncf %176 : vector<8x32xf32> to vector<8x32xbf16>
    %c0_97 = arith.constant 0 : index
    %c0_98 = arith.constant 0 : index
    %178 = vector.load %arg8[%c0_97, %c0_98] : memref<32x128xbf16, #tpu.memory_space<vmem>>, vector<32x128xbf16>
    %cst_99 = arith.constant dense<0.000000e+00> : vector<8x128xf32>
    %179 = tpu.matmul %177, %178, %cst_99 {dimension_numbers = #tpu.dot_dimension_numbers<[1], [0], [0], [1], [0, 0, 1, 1], [], []>} : vector<8x32xbf16>, vector<32x128xbf16>, vector<8x128xf32> -> vector<8x128xf32>
    %180 = arith.addf %175, %179 : vector<8x128xf32>
    %181 = vector.extract_strided_slice %180 {offsets = [0, 0], sizes = [8, 96], strides = [1, 1]} : vector<8x128xf32> to vector<8x96xf32>
    %182 = arith.negf %181 : vector<8x96xf32>
    %183 = math.exp %182 : vector<8x96xf32>
    %cst_100 = arith.constant 1.000000e+00 : f32
    %184 = vector.broadcast %cst_100 : f32 to vector<8x96xf32>
    %185 = arith.addf %184, %183 : vector<8x96xf32>
    %186 = arith.divf %184, %185 : vector<8x96xf32>
    %187 = vector.extract_strided_slice %186 {offsets = [0, 0], sizes = [8, 32], strides = [1, 1]} : vector<8x96xf32> to vector<8x32xf32>
    %188 = vector.extract_strided_slice %186 {offsets = [0, 32], sizes = [8, 32], strides = [1, 1]} : vector<8x96xf32> to vector<8x32xf32>
    %189 = vector.extract_strided_slice %186 {offsets = [0, 64], sizes = [8, 32], strides = [1, 1]} : vector<8x96xf32> to vector<8x32xf32>
    %190 = vector.extract_strided_slice %180 {offsets = [0, 96], sizes = [8, 32], strides = [1, 1]} : vector<8x128xf32> to vector<8x32xf32>
    %191 = math.tanh %190 : vector<8x32xf32>
    %c0_101 = arith.constant 0 : index
    %c0_102 = arith.constant 0 : index
    %192 = vector.load %arg16[%c0_101, %c0_102] : memref<8x32xf32, #tpu.memory_space<vmem>>, vector<8x32xf32>
    %193 = arith.mulf %188, %192 : vector<8x32xf32>
    %194 = arith.mulf %187, %191 : vector<8x32xf32>
    %195 = arith.addf %193, %194 : vector<8x32xf32>
    %196 = math.tanh %195 : vector<8x32xf32>
    %197 = arith.mulf %189, %196 : vector<8x32xf32>
    %c0_103 = arith.constant 0 : index
    %c0_104 = arith.constant 0 : index
    %198 = vector.load %arg16[%c0_103, %c0_104] : memref<8x32xf32, #tpu.memory_space<vmem>>, vector<8x32xf32>
    tpu.vector_store %arg16[%c0_103, %c0_104], %195 {strides = array<i32>} : memref<8x32xf32, #tpu.memory_space<vmem>>, vector<8x32xf32>,
    %c0_105 = arith.constant 0 : index
    %c0_106 = arith.constant 0 : index
    %199 = vector.load %arg15[%c0_105, %c0_106] : memref<8x32xf32, #tpu.memory_space<vmem>>, vector<8x32xf32>
    tpu.vector_store %arg15[%c0_105, %c0_106], %197 {strides = array<i32>} : memref<8x32xf32, #tpu.memory_space<vmem>>, vector<8x32xf32>,
    %200 = arith.truncf %171 : vector<8x32xf32> to vector<8x32xbf16>
    %201 = arith.index_cast %144 : i32 to index
    %c0_107 = arith.constant 0 : index
    %202 = vector.load %arg9[%201, %c0_107] : memref<32x32xbf16, #tpu.memory_space<vmem>>, vector<8x32xbf16>
    tpu.vector_store %arg9[%201, %c0_107], %200 {strides = array<i32>} : memref<32x32xbf16, #tpu.memory_space<vmem>>, vector<8x32xbf16>,
    %203 = arith.truncf %197 : vector<8x32xf32> to vector<8x32xbf16>
    %204 = arith.index_cast %147 : i32 to index
    %c0_108 = arith.constant 0 : index
    %205 = vector.load %arg10[%204, %c0_108] : memref<32x32xbf16, #tpu.memory_space<vmem>>, vector<8x32xbf16>
    tpu.vector_store %arg10[%204, %c0_108], %203 {strides = array<i32>} : memref<32x32xbf16, #tpu.memory_space<vmem>>, vector<8x32xbf16>,
    %c3_i32_109 = arith.constant 3 : i32
    %c8_i32_110 = arith.constant 8 : i32
    %206 = arith.muli %c3_i32_109, %c8_i32_110 : i32
    %207 = tpu.assume_multiple %206, 8 : i32
    %c3_i32_111 = arith.constant 3 : i32
    %208 = arith.subi %c3_i32_111, %c3_i32_109 : i32
    %c8_i32_112 = arith.constant 8 : i32
    %209 = arith.muli %208, %c8_i32_112 : i32
    %210 = tpu.assume_multiple %209, 8 : i32
    %211 = arith.index_cast %207 : i32 to index
    %c0_113 = arith.constant 0 : index
    %212 = vector.load %arg11[%211, %c0_113] : memref<32x128xf32, #tpu.memory_space<vmem>>, vector<8x128xf32>
    %c0_114 = arith.constant 0 : index
    %c0_115 = arith.constant 0 : index
    %213 = vector.load %arg13[%c0_114, %c0_115] : memref<8x32xf32, #tpu.memory_space<vmem>>, vector<8x32xf32>
    %214 = arith.truncf %213 : vector<8x32xf32> to vector<8x32xbf16>
    %c0_116 = arith.constant 0 : index
    %c0_117 = arith.constant 0 : index
    %215 = vector.load %arg7[%c0_116, %c0_117] : memref<32x128xbf16, #tpu.memory_space<vmem>>, vector<32x128xbf16>
    %cst_118 = arith.constant dense<0.000000e+00> : vector<8x128xf32>
    %216 = tpu.matmul %214, %215, %cst_118 {dimension_numbers = #tpu.dot_dimension_numbers<[1], [0], [0], [1], [0, 0, 1, 1], [], []>} : vector<8x32xbf16>, vector<32x128xbf16>, vector<8x128xf32> -> vector<8x128xf32>
    %217 = arith.addf %212, %216 : vector<8x128xf32>
    %218 = vector.extract_strided_slice %217 {offsets = [0, 0], sizes = [8, 96], strides = [1, 1]} : vector<8x128xf32> to vector<8x96xf32>
    %219 = arith.negf %218 : vector<8x96xf32>
    %220 = math.exp %219 : vector<8x96xf32>
    %cst_119 = arith.constant 1.000000e+00 : f32
    %221 = vector.broadcast %cst_119 : f32 to vector<8x96xf32>
    %222 = arith.addf %221, %220 : vector<8x96xf32>
    %223 = arith.divf %221, %222 : vector<8x96xf32>
    %224 = vector.extract_strided_slice %223 {offsets = [0, 0], sizes = [8, 32], strides = [1, 1]} : vector<8x96xf32> to vector<8x32xf32>
    %225 = vector.extract_strided_slice %223 {offsets = [0, 32], sizes = [8, 32], strides = [1, 1]} : vector<8x96xf32> to vector<8x32xf32>
    %226 = vector.extract_strided_slice %223 {offsets = [0, 64], sizes = [8, 32], strides = [1, 1]} : vector<8x96xf32> to vector<8x32xf32>
    %227 = vector.extract_strided_slice %217 {offsets = [0, 96], sizes = [8, 32], strides = [1, 1]} : vector<8x128xf32> to vector<8x32xf32>
    %228 = math.tanh %227 : vector<8x32xf32>
    %c0_120 = arith.constant 0 : index
    %c0_121 = arith.constant 0 : index
    %229 = vector.load %arg14[%c0_120, %c0_121] : memref<8x32xf32, #tpu.memory_space<vmem>>, vector<8x32xf32>
    %230 = arith.mulf %225, %229 : vector<8x32xf32>
    %231 = arith.mulf %224, %228 : vector<8x32xf32>
    %232 = arith.addf %230, %231 : vector<8x32xf32>
    %233 = math.tanh %232 : vector<8x32xf32>
    %234 = arith.mulf %226, %233 : vector<8x32xf32>
    %c0_122 = arith.constant 0 : index
    %c0_123 = arith.constant 0 : index
    %235 = vector.load %arg14[%c0_122, %c0_123] : memref<8x32xf32, #tpu.memory_space<vmem>>, vector<8x32xf32>
    tpu.vector_store %arg14[%c0_122, %c0_123], %232 {strides = array<i32>} : memref<8x32xf32, #tpu.memory_space<vmem>>, vector<8x32xf32>,
    %c0_124 = arith.constant 0 : index
    %c0_125 = arith.constant 0 : index
    %236 = vector.load %arg13[%c0_124, %c0_125] : memref<8x32xf32, #tpu.memory_space<vmem>>, vector<8x32xf32>
    tpu.vector_store %arg13[%c0_124, %c0_125], %234 {strides = array<i32>} : memref<8x32xf32, #tpu.memory_space<vmem>>, vector<8x32xf32>,
    %237 = arith.index_cast %210 : i32 to index
    %c0_126 = arith.constant 0 : index
    %238 = vector.load %arg12[%237, %c0_126] : memref<32x128xf32, #tpu.memory_space<vmem>>, vector<8x128xf32>
    %c0_127 = arith.constant 0 : index
    %c0_128 = arith.constant 0 : index
    %239 = vector.load %arg15[%c0_127, %c0_128] : memref<8x32xf32, #tpu.memory_space<vmem>>, vector<8x32xf32>
    %240 = arith.truncf %239 : vector<8x32xf32> to vector<8x32xbf16>
    %c0_129 = arith.constant 0 : index
    %c0_130 = arith.constant 0 : index
    %241 = vector.load %arg8[%c0_129, %c0_130] : memref<32x128xbf16, #tpu.memory_space<vmem>>, vector<32x128xbf16>
    %cst_131 = arith.constant dense<0.000000e+00> : vector<8x128xf32>
    %242 = tpu.matmul %240, %241, %cst_131 {dimension_numbers = #tpu.dot_dimension_numbers<[1], [0], [0], [1], [0, 0, 1, 1], [], []>} : vector<8x32xbf16>, vector<32x128xbf16>, vector<8x128xf32> -> vector<8x128xf32>
    %243 = arith.addf %238, %242 : vector<8x128xf32>
    %244 = vector.extract_strided_slice %243 {offsets = [0, 0], sizes = [8, 96], strides = [1, 1]} : vector<8x128xf32> to vector<8x96xf32>
    %245 = arith.negf %244 : vector<8x96xf32>
    %246 = math.exp %245 : vector<8x96xf32>
    %cst_132 = arith.constant 1.000000e+00 : f32
    %247 = vector.broadcast %cst_132 : f32 to vector<8x96xf32>
    %248 = arith.addf %247, %246 : vector<8x96xf32>
    %249 = arith.divf %247, %248 : vector<8x96xf32>
    %250 = vector.extract_strided_slice %249 {offsets = [0, 0], sizes = [8, 32], strides = [1, 1]} : vector<8x96xf32> to vector<8x32xf32>
    %251 = vector.extract_strided_slice %249 {offsets = [0, 32], sizes = [8, 32], strides = [1, 1]} : vector<8x96xf32> to vector<8x32xf32>
    %252 = vector.extract_strided_slice %249 {offsets = [0, 64], sizes = [8, 32], strides = [1, 1]} : vector<8x96xf32> to vector<8x32xf32>
    %253 = vector.extract_strided_slice %243 {offsets = [0, 96], sizes = [8, 32], strides = [1, 1]} : vector<8x128xf32> to vector<8x32xf32>
    %254 = math.tanh %253 : vector<8x32xf32>
    %c0_133 = arith.constant 0 : index
    %c0_134 = arith.constant 0 : index
    %255 = vector.load %arg16[%c0_133, %c0_134] : memref<8x32xf32, #tpu.memory_space<vmem>>, vector<8x32xf32>
    %256 = arith.mulf %251, %255 : vector<8x32xf32>
    %257 = arith.mulf %250, %254 : vector<8x32xf32>
    %258 = arith.addf %256, %257 : vector<8x32xf32>
    %259 = math.tanh %258 : vector<8x32xf32>
    %260 = arith.mulf %252, %259 : vector<8x32xf32>
    %c0_135 = arith.constant 0 : index
    %c0_136 = arith.constant 0 : index
    %261 = vector.load %arg16[%c0_135, %c0_136] : memref<8x32xf32, #tpu.memory_space<vmem>>, vector<8x32xf32>
    tpu.vector_store %arg16[%c0_135, %c0_136], %258 {strides = array<i32>} : memref<8x32xf32, #tpu.memory_space<vmem>>, vector<8x32xf32>,
    %c0_137 = arith.constant 0 : index
    %c0_138 = arith.constant 0 : index
    %262 = vector.load %arg15[%c0_137, %c0_138] : memref<8x32xf32, #tpu.memory_space<vmem>>, vector<8x32xf32>
    tpu.vector_store %arg15[%c0_137, %c0_138], %260 {strides = array<i32>} : memref<8x32xf32, #tpu.memory_space<vmem>>, vector<8x32xf32>,
    %263 = arith.truncf %234 : vector<8x32xf32> to vector<8x32xbf16>
    %264 = arith.index_cast %207 : i32 to index
    %c0_139 = arith.constant 0 : index
    %265 = vector.load %arg9[%264, %c0_139] : memref<32x32xbf16, #tpu.memory_space<vmem>>, vector<8x32xbf16>
    tpu.vector_store %arg9[%264, %c0_139], %263 {strides = array<i32>} : memref<32x32xbf16, #tpu.memory_space<vmem>>, vector<8x32xbf16>,
    %266 = arith.truncf %260 : vector<8x32xf32> to vector<8x32xbf16>
    %267 = arith.index_cast %210 : i32 to index
    %c0_140 = arith.constant 0 : index
    %268 = vector.load %arg10[%267, %c0_140] : memref<32x32xbf16, #tpu.memory_space<vmem>>, vector<8x32xbf16>
    tpu.vector_store %arg10[%267, %c0_140], %266 {strides = array<i32>} : memref<32x32xbf16, #tpu.memory_space<vmem>>, vector<8x32xbf16>,
    %c4_i32 = arith.constant 4 : i32
    return
  }
  func.func @transform_0(%arg0: i32) -> (i32, i32) {
    %c0_i32 = arith.constant 0 : i32
    %c0_i32_0 = arith.constant 0 : i32
    return %arg0, %c0_i32 : i32, i32
  }
  func.func @transform_1(%arg0: i32) -> (i32, i32) {
    %c1_i32 = arith.constant 1 : i32
    %0 = arith.subi %c1_i32, %arg0 : i32
    %c0_i32 = arith.constant 0 : i32
    %c0_i32_0 = arith.constant 0 : i32
    return %0, %c0_i32 : i32, i32
  }
  func.func @transform_2(%arg0: i32) -> (i32, i32) {
    %c0_i32 = arith.constant 0 : i32
    %c0_i32_0 = arith.constant 0 : i32
    %c0_i32_1 = arith.constant 0 : i32
    return %c0_i32, %c0_i32_0 : i32, i32
  }
  func.func @transform_3(%arg0: i32) -> (i32, i32) {
    %c0_i32 = arith.constant 0 : i32
    %c0_i32_0 = arith.constant 0 : i32
    %c0_i32_1 = arith.constant 0 : i32
    return %c0_i32, %c0_i32_0 : i32, i32
  }
  func.func @transform_4(%arg0: i32) -> (i32, i32) {
    %c0_i32 = arith.constant 0 : i32
    %c0_i32_0 = arith.constant 0 : i32
    %c0_i32_1 = arith.constant 0 : i32
    return %c0_i32, %c0_i32_0 : i32, i32
  }
  func.func @transform_5(%arg0: i32) -> (i32, i32) {
    %c0_i32 = arith.constant 0 : i32
    %c0_i32_0 = arith.constant 0 : i32
    %c0_i32_1 = arith.constant 0 : i32
    return %c0_i32, %c0_i32_0 : i32, i32
  }
  func.func @transform_6(%arg0: i32) -> (i32, i32) {
    %c0_i32 = arith.constant 0 : i32
    %c0_i32_0 = arith.constant 0 : i32
    %c0_i32_1 = arith.constant 0 : i32
    return %c0_i32, %c0_i32_0 : i32, i32
  }
  func.func @transform_7(%arg0: i32) -> (i32, i32) {
    %c0_i32 = arith.constant 0 : i32
    %c0_i32_0 = arith.constant 0 : i32
    %c0_i32_1 = arith.constant 0 : i32
    return %c0_i32, %c0_i32_0 : i32, i32
  }
  func.func @transform_8(%arg0: i32) -> (i32, i32) {
    %c0_i32 = arith.constant 0 : i32
    %c0_i32_0 = arith.constant 0 : i32
    return %arg0, %c0_i32 : i32, i32
  }
  func.func @transform_9(%arg0: i32) -> (i32, i32) {
    %c1_i32 = arith.constant 1 : i32
    %0 = arith.subi %c1_i32, %arg0 : i32
    %c0_i32 = arith.constant 0 : i32
    %c0_i32_0 = arith.constant 0 : i32
    return %0, %c0_i32 : i32, i32
  }
}

</mosaic_0001>

<bundles_post_ra>
// kernel: tpu_custom_call.1
= control target key start
LH: loop header
LB: loop body
LE: loop exit
PB: predicated region body
PF: predicated region fallthrough
CT: control target
= control target key end

     0   :  { %6 = vsyncpa [#allocation3], 0  ;;  %s305_s0 = inlined_call_operand.hbm [shape: f32[8,128], index: 0, kind: input, shape index: {}]   ;;  %s306_s1 = inlined_call_operand.hbm [shape: f32[8,128], index: 1, kind: output, shape index: {}]  }
   0x1   :  { %7 = vsyncpa [#allocation4], 0  ;;  %s258_s6 = smov 0  }
   0x2 LB: > { %s145_s7 = sadd.s32 4294967295, %s244_s6   ;;  %p146_p0 = scmp.ge.s32.totalorder %s244_s6, 1  ;;  %s244_s6 = sphi %s258_s6, %s13_s6  }
   0x3   : > { %p60_p1 = scmp.lt.s32.totalorder %s244_s6, 3  ;;  %p270_p3 = scmp.eq.s32.totalorder %s145_s7, 0 }
   0x4   : > { %s246_s10 = smov [#allocation2]  }
   0x5   : > { %p266_p2 = pnand %p146_p0, %p60_p1  ;;  %s73_s11 = sshll.u32 %s246_s10, 4  ;;  %s74_s11 = int_to_ptr.vmem [resolvable:$true] %s73_s11 }
   0x6   : > { %s191_s12 = scalar_lea.vmem %s74_s11, 128  ;;  %p199_p10 = scmp.lt.s32.totalorder %s74_s11, %s74_s11 }
   0x7   : > { %p162_p4 = pneg %p266_p2  ;;  %p192_p7 = scmp.ne.s32.totalorder %s74_s11, %s191_s12 }
   0x8   : > { %p200_p11 = scmp.lt.s32.totalorder %s191_s12, %s191_s12 }
   0x9   : > { %p163_p5 = pnand %p270_p3, %p162_p4 }
   0xa   : > { %p201_p12 = por %p200_p11, %p199_p10 }
   0xb   : > { %p182_p6 = pneg %p163_p5 }
   0xd   : > { %p194_p8 = pnand %p192_p7, %p182_p6 }
   0xf   : > { %p195_p9 = pneg %p194_p8 }
  0x11   : > { %p202_p13 = pnand %p201_p12, %p195_p9 }
  0x13   : > { %205 = shalt.err (!%p202_p13)
}
  0x14   : > { %165 = dma.hbm_to_vmem [thread:$0]  (!%p163_p5), %s305_s0, 128, %s74_s11, [#allocation3]  }
  0x15   : > { %86 = sbr.rel (%p266_p2) target bundleno = 42 (0x2a), region = 24 }
  0x1a   : > { %235 = dma.done.wait (%p270_p3), [#allocation3], 128  }
  0x1b   : > { %237 = vsyncadd (%p270_p3), [#allocation3], 4294967168  ;;  %s247_s15 = smov [#allocation5]   ;;  %v96_v0 = vld [vmem:[#allocation2] sm:$0xff]  ;;  %p287_p0 = scmp.eq.s32.totalorder %s145_s7, 1 }
  0x1c   : > { %s106_s16 = sshll.u32 %s247_s15, 4  ;;  %v97_v1 = vadd.f32 1.0, %v96_v0  ;;  %s107_s16 = int_to_ptr.vmem [resolvable:$true] %s106_s16 }
  0x1d   : > { %s206_s18 = scalar_lea.vmem %s107_s16, 128  ;;  %p213_p5 = scmp.lt.s32.totalorder %s107_s16, %s107_s16 }
  0x1e   : > { %98 = vst [vmem:[#allocation5] sm:$0xff] %v97_v1  ;;  %p207_p1 = scmp.ne.s32.totalorder %s107_s16, %s206_s18  ;;  %p214_p6 = scmp.lt.s32.totalorder %s206_s18, %s206_s18 }
  0x20   : > { %p208_p2 = pnand %p207_p1, %p287_p0  ;;  %p215_p7 = por %p214_p6, %p213_p5 }
  0x22   : > { %p209_p4 = pneg %p208_p2 }
  0x24   : > { %p216_p3 = pnand %p215_p7, %p209_p4 }
  0x26   : > { %219 = shalt.err (!%p216_p3)
}
  0x27   : > { %159 = dma.vmem_to_hbm [thread:$0]  (%p287_p0), %s107_s16, 128, %s306_s1, [#allocation4]  }
  0x28   : > { %239 = dma.done.wait (%p287_p0), [#allocation4], 128  }
  0x29   : > { %241 = vsyncadd (%p287_p0), [#allocation4], 4294967168 }
  0x2a PF: > { %s13_s6 = sadd.s32 1, %s244_s6  }
  0x2b   : > { %p10_p8 = scmp.ge.s32.totalorder %s13_s6, 4  }
  0x2d   :  { %12 = sbr.rel (!%p10_p8) target bundleno = 2 (0x2), region = 53 }
  0x32   :  { %119 = vsyncpa [#allocation3], 1 }
  0x33   :  { %121 = vsyncpa [#allocation3 + $0x1], 1 }
  0x34   :  { %122 = vsyncpa [#allocation4], 1 }
  0x35   :  { %124 = vsyncpa [#allocation4 + $0x1], 1 }

// kernel: tpu_custom_call.1
= control target key start
LH: loop header
LB: loop body
LE: loop exit
PB: predicated region body
PF: predicated region fallthrough
CT: control target
= control target key end

     0   :  { %s1947_s30 = smov 0   ;;  %s2220_s0 = inlined_call_operand.vmem [shape: bf16[64,32], index: 0, kind: input, shape index: {}]   ;;  %s2221_s1 = inlined_call_operand.vmem [shape: bf16[64,32], index: 1, kind: input, shape index: {}]   ;;  %s2222_s2 = inlined_call_operand.vmem [shape: bf16[32,128], index: 2, kind: input, shape index: {}]   ;;  %s2223_s3 = inlined_call_operand.vmem [shape: bf16[32,128], index: 3, kind: input, shape index: {}]   ;;  %s2224_s4 = inlined_call_operand.vmem [shape: f32[1,128], index: 4, kind: input, shape index: {}]   ;;  %s2225_s5 = inlined_call_operand.vmem [shape: f32[1,128], index: 5, kind: input, shape index: {}]   ;;  %s2226_s6 = inlined_call_operand.vmem [shape: bf16[32,128], index: 6, kind: input, shape index: {}]   ;;  %s2227_s7 = inlined_call_operand.vmem [shape: bf16[32,128], index: 7, kind: input, shape index: {}]   ;;  %s2228_s8 = inlined_call_operand.vmem [shape: bf16[64,32], index: 8, kind: output, shape index: {0}]   ;;  %s2229_s9 = inlined_call_operand.vmem [shape: bf16[64,32], index: 9, kind: output, shape index: {1}]  }
   0x1 LB: > { %s1585_s10 = sadd.s32 4294967295, %s1889_s30   ;;  %p1589_p0 = scmp.ge.s32.totalorder %s1889_s30, 1  ;;  %s1889_s30 = sphi %s1947_s30, %s20_s30  }
   0x2   : > { %p308_p1 = scmp.lt.s32.totalorder %s1889_s30, 3 }
   0x4   : > { %p309_p2 = pnand %p1589_p0, %p308_p1 }
   0x5   : > { %s1590_s11 = sshll.u32 (!%p309_p2), %s1585_s10, 2  ;;  %s362_s12 = ssub.s32 (!%p309_p2), 1, %s1585_s10 }
   0x6   : > { %312 = sbr.rel (%p309_p2) target bundleno = 2835 (0xb13), region = 52  ;;  %p357_p3 = scmp.lt.s32.totalorder (!%p309_p2), %s1590_s11, 7 }
   0x7   : > { %s1592_s13 = sshll.u32 (!%p309_p2), %s362_s12, 2  ;;  %p1598_p5 = scmp.ne.s32.totalorder (!%p309_p2), %s1585_s10, 0 }
   0x8   : > { %p364_p4 = scmp.lt.s32.totalorder (!%p309_p2), %s1592_s13, 7 }
   0xb   : > { %s2231_s11 = smov (!%p357_p3, %s1590_s11), 7  ;;  %s2233_s13 = smov (!%p364_p4, %s1592_s13), 7 }
   0xc   : > { %s1591_s14 = sshll.u32 %s2231_s11, 2  ;;  %s1593_s18 = sshll.u32 %s2233_s13, 2 }
   0xd   : > { %s360_s17 = scalar_lea.vmem %s2220_s0, %s1591_s14  ;;  %s367_s21 = scalar_lea.vmem %s2221_s1, %s1593_s18 }
   0xe   : > { %s1964_s24 = scalar_lea.vmem %s2228_s8, %s1591_s14  ;;  %s1969_s27 = scalar_lea.vmem %s2229_s9, %s1593_s18 }
   0xf   : > { %388 = sbr.rel (%p1598_p5) target bundleno = 23 (0x17), region = 56 }
  0x14   : > { %vm389_vm0 = vcmask 261120   ;;  %v1891_v0 = vmov 0.0  }
  0x15   : > { %390 = vst.msk [vmem:[#allocation4] sm:$0xff] %vm389_vm0, %v1891_v0  ;;  %391 = vst.msk [vmem:[#allocation5] sm:$0xff] %vm389_vm0, %v1891_v0 }
  0x16   : > { %392 = vst.msk [vmem:[#allocation6] sm:$0xff] %vm389_vm0, %v1891_v0  ;;  %393 = vst.msk [vmem:[#allocation7] sm:$0xff] %vm389_vm0, %v1891_v0 }
  0x17 PF: > { %v1795_v1 = vld [vmem:[%s2222_s2 + $0x8] sm:$0xff]   ;;  %v1797_v3 = vld [vmem:[%s2222_s2] sm:$0xff]   ;;  %vm431_vm1 = vcmask 261120   ;;  %v1892_v9 = vmov 0.0   ;;  %vm1893_vm2 = vmmov 0   ;;  %s1894_s25 = smov 32  }
  0x18   : > { %v1796_v2 = vld [vmem:[%s2223_s3 + $0x8] sm:$0xff]   ;;  %1701 = vmatprep.subr.bf16.mxu0 %v1795_v1  ;;  %v1798_v4 = vld [vmem:[%s2223_s3] sm:$0xff]   ;;  %s1895_s20 = smov 64   ;;  %vm799_vm3 = vcmask 257024  }
  0x19   : > { %1709 = vmatprep.subr.bf16.mxu1 %v1796_v2  ;;  %1702 = vmatpush3.bf16.msra.mxu0 %v1795_v1  ;;  %v1799_v5 = vld [vmem:[%s360_s17] sm:$0xff]   ;;  %v1801_v7 = vld [vmem:[%s360_s17 + $0x8] sm:$0xff]   ;;  %s1896_s17 = smov 96  }
  0x1a   : > { %1710 = vmatpush3.bf16.msra.mxu1 %v1796_v2  ;;  %1703 = vmatprep.subr.bf16.mxu0 %v1797_v3  ;;  %v1800_v6 = vld [vmem:[%s367_s21] sm:$0xff]   ;;  %v1802_v8 = vld [vmem:[%s367_s21 + $0x8] sm:$0xff]  }
  0x1b   : > { %1711 = vmatprep.subr.bf16.mxu1 %v1798_v4  ;;  %1705 = vmatprep.mubr.msk.bf16.mxu0 %vm431_vm1, %v1799_v5  ;;  %v1803_v10 = vld [vmem:[%s2226_s6 + $0x8] sm:$0xff]   ;;  %v1805_v12 = vld [vmem:[%s2226_s6] sm:$0xff]  }
  0x1c   : > { %1713 = vmatprep.mubr.msk.bf16.mxu1 %vm431_vm1, %v1800_v6  ;;  %v1804_v11 = vld [vmem:[%s2227_s7 + $0x8] sm:$0xff]   ;;  %v1806_v13 = vld [vmem:[%s2227_s7] sm:$0xff]  }
  0x1d   : > { %1704 = vmatpush3.bf16.msra.mxu0 %v1797_v3  ;;  %v588_v14 = vld [vmem:[#allocation4] sm:$0xff]  ;;  %v691_v15 = vld [vmem:[#allocation6] sm:$0xff]  ;;  %v657_v16 = vld [vmem:[#allocation5] sm:$0xff] }
  0x1e   : > { %1712 = vmatpush3.bf16.msra.mxu1 %v1798_v4  ;;  %1717 = vmatprep.subr.bf16.mxu0 %v1892_v9  ;;  %v760_v17 = vld [vmem:[#allocation7] sm:$0xff]  ;;  %v589_v18 = vpack.c.bf16 %v588_v14, %v588_v14  ;;  %v692_v19 = vpack.c.bf16 %v691_v15, %v691_v15  ;;  %v1599_v20 = vld [vmem:[%s2224_s4] ss:$0 sm:$0xff] }
  0x1f   : > { %1725 = vmatprep.subr.bf16.mxu1 %v1892_v9  ;;  %659 = vrot.lane.b32.xlu1 %v657_v16, %s1894_s25  ;;  %v1606_v21 = vld [vmem:[%s2225_s5] ss:$0 sm:$0xff] }
  0x20   : > { %1706 = vmatmul.mubr.msk.bf16.vlgmr.msra.gmra.mxu0 %vm431_vm1, %v1801_v7 }
  0x21   : > { %1714 = vmatmul.mubr.msk.bf16.vlgmr.msra.gmra.mxu1 %vm431_vm1, %v1802_v8  ;;  %1718 = vmatpush3.bf16.msra.mxu0 %v1803_v10  ;;  %v1807_v8 = vld [vmem:[%s2226_s6 + $0x8] sm:$0xff]   ;;  %v1808_v10 = vld [vmem:[%s2226_s6] sm:$0xff]  }
  0x22   : > { %1726 = vmatpush3.bf16.msra.mxu1 %v1804_v11  ;;  %1719 = vmatprep.subr.bf16.mxu0 %v1892_v9  ;;  %v1809_v11 = vld [vmem:[%s2227_s7 + $0x8] sm:$0xff]  }
  0x23   : > { %1727 = vmatprep.subr.bf16.mxu1 %v1892_v9  ;;  %1721 = vmatprep.mubr.msk.bf16.mxu0 %vm1893_vm2, %v1892_v9 }
  0x24   : > { %1729 = vmatprep.mubr.msk.bf16.mxu1 %vm1893_vm2, %v1892_v9  ;;  %762 = vrot.lane.b32.xlu1 %v760_v17, %s1894_s25 }
  0x25   : > { %1720 = vmatpush3.bf16.msra.mxu0 %v1805_v12 }
  0x26   : > { %1728 = vmatpush3.bf16.msra.mxu1 %v1806_v13  ;;  %1733 = vmatprep.subr.bf16.mxu0 %v1892_v9  ;;  %v1810_v13 = vld [vmem:[%s2227_s7] sm:$0xff]  }
  0x27   : > { %1741 = vmatprep.subr.bf16.mxu1 %v1892_v9 }
  0x28   : > { %1722 = vmatmul.mubr.msk.bf16.vlgmr.msra.gmra.mxu0 %vm431_vm1, %v589_v18 }
  0x29   : > { %1730 = vmatmul.mubr.msk.bf16.vlgmr.msra.gmra.mxu1 %vm431_vm1, %v692_v19  ;;  %1737 = vmatprep.mubr.msk.bf16.mxu0 %vm1893_vm2, %v1892_v9 }
  0x2a   : > { %1745 = vmatprep.mubr.msk.bf16.mxu1 %vm1893_vm2, %v1892_v9  ;;  %1734 = vmatpush3.bf16.msra.mxu0 %v1807_v8 }
  0x2b   : > { %1735 = vmatprep.subr.bf16.mxu0 %v1892_v9  ;;  %1742 = vmatpush3.bf16.msra.mxu1 %v1809_v11 }
  0x2c   : > { %1743 = vmatprep.subr.bf16.mxu1 %v1892_v9 }
  0x2e   : > { %1736 = vmatpush3.bf16.msra.mxu0 %v1808_v10 }
  0x2f   : > { %1749 = vmatprep.subr.bf16.mxu0 %v1892_v9  ;;  %1744 = vmatpush3.bf16.msra.mxu1 %v1810_v13 }
  0x30   : > { %1757 = vmatprep.subr.bf16.mxu1 %v1892_v9 }
  0x91   : > { %v660_v62 = vpop.permute.xlu1 %659 }
  0x96   : > { %v763_v0 = vpop.permute.xlu1 %762 }
  0xe0   : > { %v1707_v22 = vpop.f32.mrf.mxu0 }
  0xe1   : > { %v2023_v23 = vadd.f32 %v1707_v22, %v1599_v20  ;;  %v1715_v24 = vpop.f32.mrf.mxu1 }
  0xe2   : > { %v2025_v25 = vadd.f32 %v1715_v24, %v1606_v21  ;;  %v472_v26 = vpop.f32.mrf.mxu0 }
  0xe3   : > { %v568_v27 = vpop.f32.mrf.mxu1  ;;  %v473_v33 = vadd.f32 %v1599_v20, %v472_v26 }
  0xe4   : > { %v2027_v28 = vadd.f32 %v1606_v21, %v568_v27  ;;  %v1708_v29 = vpop.f32.mrf.mxu0 }
  0xe5   : > { %v2029_v30 = vadd.f32 %v1708_v29, %v1599_v20  ;;  %v1716_v31 = vpop.f32.mrf.mxu1 }
  0xe6   : > { %v475_v32 = vpop.f32.mrf.mxu0  ;;  %v580_v38 = vadd.f32 %v1716_v31, %v1606_v21 }
  0xe7   : > { %v2031_v34 = vadd.f32 %v1599_v20, %v475_v32  ;;  %v571_v35 = vpop.f32.mrf.mxu1 }
  0xe8   : > { %v2033_v36 = vadd.f32 %v1606_v21, %v571_v35  ;;  %v643_v37 = vpop.f32.mrf.mxu0 }
  0xe9   : > { %v649_v39 = vadd.f32 %v643_v37, %v473_v33  ;;  %v746_v40 = vpop.f32.mrf.mxu1 }
  0xea   : > { %v1723_v41 = vpop.f32.mrf.mxu0  ;;  %v752_v42 = vadd.f32 %v746_v40, %v580_v38 }
  0xeb   : > { %1819 = vtanh.f32 %v649_v39  ;;  %v1731_v43 = vpop.f32.mrf.mxu1  ;;  %v1616_v50 = vmul.f32 -1.442695, %v649_v39 }
  0xec   : > { %v646_v44 = vpop.f32.mrf.mxu0  ;;  %1821 = vtanh.f32 %v752_v42  ;;  %v1620_v51 = vmul.f32 -1.442695, %v752_v42 }
  0xed   : > { %v749_v45 = vpop.f32.mrf.mxu1  ;;  %1823 = vpow2.f32 %v1616_v50 }
  0xee   : > { %v1724_v46 = vpop.f32.mrf.mxu0  ;;  %1825 = vpow2.f32 %v1620_v51 }
  0xef   : > { %v1732_v47 = vpop.f32.mrf.mxu1 }
  0xf8   : > { %v1820_v48 = vpop.eup %1819 }
  0xf9   : > { %664 = vrot.lane.b32.xlu0 %v1820_v48, %s1894_s25  ;;  %v1822_v49 = vpop.eup %1821 }
  0xfa   : > { %v1824_v52 = vpop.eup %1823 }
  0xfb   : > { %v653_v53 = vadd.f32 1.0, %v1824_v52  ;;  %v1826_v54 = vpop.eup %1825 }
  0xfc   : > { %v756_v55 = vadd.f32 1.0, %v1826_v54 }
  0xfd   : > { %767 = vrot.lane.b32.xlu0 %v1822_v49, %s1894_s25  ;;  %1827 = vrcp.f32 %v653_v53 }
  0xfe   : > { %1829 = vrcp.f32 %v756_v55 }
 0x10a   : > { %v1828_v56 = vpop.eup %1827 }
 0x10b   : > { %v1830_v59 = vpop.eup %1829  ;;  %v662_v63 = vmul.f32 %v1828_v56, %v660_v62 }
 0x10c   : > { %v765_v3 = vmul.f32 %v1830_v59, %v763_v0 }
 0x16b   : > { %v665_v57 = vpop.permute.xlu0 %664 }
 0x16c   : > { %v667_v58 = vmul.f32 %v1828_v56, %v665_v57 }
 0x16e   : > { %669 = vrot.lane.b32.xlu0 %v667_v58, %s1894_s25 }
 0x16f   : > { %v768_v60 = vpop.permute.xlu0 %767 }
 0x170   : > { %v770_v61 = vmul.f32 %v1830_v59, %v768_v60 }
 0x172   : > { %772 = vrot.lane.b32.xlu1 %v770_v61, %s1894_s25 }
 0x1e0   : > { %v670_v1 = vpop.permute.xlu0 %669 }
 0x1e1   : > { %v672_v2 = vadd.f32 %v670_v1, %v662_v63  ;;  %v1811_v1 = vld [vmem:[%s2226_s6 + $0x8] sm:$0xff]  }
 0x1e3   : > { %1831 = vtanh.f32 %v672_v2 }
 0x1e4   : > { %v773_v4 = vpop.permute.xlu1 %772 }
 0x1e5   : > { %v775_v5 = vadd.f32 %v773_v4, %v765_v3  ;;  %v1813_v3 = vld [vmem:[%s2226_s6] sm:$0xff]  }
 0x1e7   : > { %1833 = vtanh.f32 %v775_v5 }
 0x1f0   : > { %v1832_v6 = vpop.eup %1831 }
 0x1f1   : > { %675 = vrot.lane.b32.xlu0 %v1832_v6, %s1894_s25 }
 0x1f4   : > { %v1834_v7 = vpop.eup %1833 }
 0x1f5   : > { %778 = vrot.lane.b32.xlu1 %v1834_v7, %s1894_s25 }
 0x263   : > { %v676_v12 = vpop.permute.xlu0 %675 }
 0x264   : > { %v2056_v14 = vmul.f32 %v1828_v56, %v676_v12 }
 0x266   : > { %685 = vrot.lane.b32.xlu0 %v2056_v14, %s1895_s20 }
 0x267   : > { %v779_v15 = vpop.permute.xlu1 %778 }
 0x268   : > { %v2061_v16 = vmul.f32 %v1830_v59, %v779_v15 }
 0x26a   : > { %788 = vrot.lane.b32.xlu1 %v2061_v16, %s1895_s20  ;;  %680 = vrot.lane.b32.xlu0 %v672_v2, %s1896_s17  ;;  %v1812_v2 = vld [vmem:[%s2227_s7 + $0x8] sm:$0xff]  }
 0x26e   : > { %783 = vrot.lane.b32.xlu1 %v775_v5, %s1896_s17  ;;  %v1814_v5 = vld [vmem:[%s2227_s7] sm:$0xff]  }
 0x2d8   : > { %v686_v17 = vpop.permute.xlu0 %685 }
 0x2d9   : > { %688 = vst.msk [vmem:[#allocation4] sm:$0xff] %vm431_vm1, %v686_v17 }
 0x2dc   : > { %v789_v18 = vpop.permute.xlu1 %788  ;;  %v681_v19 = vpop.permute.xlu0 %680 }
 0x2dd   : > { %791 = vst.msk [vmem:[#allocation6] sm:$0xff] %vm431_vm1, %v789_v18  ;;  %683 = vst.msk [vmem:[#allocation5] sm:$0xff] %vm431_vm1, %v681_v19 }
 0x2e0   : > { %v784_v20 = vpop.permute.xlu1 %783  ;;  %v812_v21 = vld [vmem:[#allocation4] sm:$0xff] }
 0x2e1   : > { %786 = vst.msk [vmem:[#allocation7] sm:$0xff] %vm431_vm1, %v784_v20  ;;  %v813_v22 = vpack.c.bf16 %v812_v21, %v812_v21 }
 0x2e3   : > { %1738 = vmatmul.mubr.msk.bf16.vlgmr.msra.gmra.mxu0 %vm431_vm1, %v813_v22 }
 0x2e4   : > { %v915_v24 = vld [vmem:[#allocation6] sm:$0xff]  ;;  %1753 = vmatprep.mubr.msk.bf16.mxu0 %vm1893_vm2, %v1892_v9  ;;  %v881_v43 = vld [vmem:[#allocation5] sm:$0xff]  ;;  %1750 = vmatpush3.bf16.msra.mxu0 %v1811_v1 }
 0x2e5   : > { %v916_v26 = vpack.c.bf16 %v915_v24, %v915_v24  ;;  %1751 = vmatprep.subr.bf16.mxu0 %v1892_v9 }
 0x2e7   : > { %1746 = vmatmul.mubr.msk.bf16.vlgmr.msra.gmra.mxu1 %vm431_vm1, %v916_v26 }
 0x2e8   : > { %1761 = vmatprep.mubr.msk.bf16.mxu1 %vm1893_vm2, %v1892_v9  ;;  %1758 = vmatpush3.bf16.msra.mxu1 %v1812_v2 }
 0x2e9   : > { %1759 = vmatprep.subr.bf16.mxu1 %v1892_v9  ;;  %1752 = vmatpush3.bf16.msra.mxu0 %v1813_v3 }
 0x2ea   : > { %1765 = vmatprep.subr.bf16.mxu0 %v1892_v9 }
 0x2ec   : > { %1760 = vmatpush3.bf16.msra.mxu1 %v1814_v5 }
 0x2ed   : > { %1773 = vmatprep.subr.bf16.mxu1 %v1892_v9 }
 0x3a3   : > { %v867_v27 = vpop.f32.mrf.mxu0 }
 0x3a4   : > { %v873_v29 = vadd.f32 %v867_v27, %v2031_v34  ;;  %v984_v34 = vld [vmem:[#allocation7] sm:$0xff] }
 0x3a5   : > { %v1739_v31 = vpop.f32.mrf.mxu0 }
 0x3a6   : > { %1835 = vtanh.f32 %v873_v29  ;;  %v1627_v44 = vmul.f32 -1.442695, %v873_v29 }
 0x3a7   : > { %v870_v32 = vpop.f32.mrf.mxu0  ;;  %v970_v33 = vpop.f32.mrf.mxu1 }
 0x3a8   : > { %v976_v35 = vadd.f32 %v970_v33, %v2025_v25 }
 0x3a9   : > { %v1740_v37 = vpop.f32.mrf.mxu0  ;;  %v1747_v38 = vpop.f32.mrf.mxu1 }
 0x3aa   : > { %1837 = vtanh.f32 %v976_v35  ;;  %v1631_v25 = vmul.f32 -1.442695, %v976_v35 }
 0x3ab   : > { %v973_v39 = vpop.f32.mrf.mxu1  ;;  %1839 = vpow2.f32 %v1627_v44 }
 0x3ac   : > { %1841 = vpow2.f32 %v1631_v25 }
 0x3ad   : > { %v1748_v40 = vpop.f32.mrf.mxu1 }
 0x3b3   : > { %v1836_v41 = vpop.eup %1835 }
 0x3b4   : > { %888 = vrot.lane.b32.xlu0 %v1836_v41, %s1894_s25 }
 0x3b7   : > { %v1838_v42 = vpop.eup %1837 }
 0x3b8   : > { %991 = vrot.lane.b32.xlu1 %v1838_v42, %s1894_s25  ;;  %883 = vrot.lane.b32.xlu0 %v881_v43, %s1894_s25  ;;  %v1840_v45 = vpop.eup %1839 }
 0x3b9   : > { %v877_v46 = vadd.f32 1.0, %v1840_v45  ;;  %v1842_v47 = vpop.eup %1841 }
 0x3ba   : > { %v980_v48 = vadd.f32 1.0, %v1842_v47 }
 0x3bb   : > { %1843 = vrcp.f32 %v877_v46 }
 0x3bc   : > { %986 = vrot.lane.b32.xlu1 %v984_v34, %s1894_s25  ;;  %1845 = vrcp.f32 %v980_v48 }
 0x3c8   : > { %v1844_v49 = vpop.eup %1843 }
 0x3c9   : > { %v1846_v52 = vpop.eup %1845 }
 0x426   : > { %v889_v50 = vpop.permute.xlu0 %888 }
 0x427   : > { %v891_v51 = vmul.f32 %v1844_v49, %v889_v50 }
 0x429   : > { %893 = vrot.lane.b32.xlu0 %v891_v51, %s1894_s25 }
 0x42a   : > { %v992_v53 = vpop.permute.xlu1 %991  ;;  %v884_v55 = vpop.permute.xlu0 %883 }
 0x42b   : > { %v994_v54 = vmul.f32 %v1846_v52, %v992_v53  ;;  %v886_v56 = vmul.f32 %v1844_v49, %v884_v55 }
 0x42d   : > { %996 = vrot.lane.b32.xlu1 %v994_v54, %s1894_s25 }
 0x42e   : > { %v987_v57 = vpop.permute.xlu1 %986 }
 0x42f   : > { %v989_v60 = vmul.f32 %v1846_v52, %v987_v57 }
 0x49b   : > { %v894_v58 = vpop.permute.xlu0 %893 }
 0x49c   : > { %v896_v59 = vadd.f32 %v894_v58, %v886_v56  ;;  %v1815_v58 = vld [vmem:[%s2226_s6 + $0x8] sm:$0xff]  }
 0x49e   : > { %1847 = vtanh.f32 %v896_v59 }
 0x49f   : > { %v997_v61 = vpop.permute.xlu1 %996 }
 0x4a0   : > { %v999_v62 = vadd.f32 %v997_v61, %v989_v60  ;;  %v1817_v60 = vld [vmem:[%s2226_s6] sm:$0xff]  }
 0x4a2   : > { %1849 = vtanh.f32 %v999_v62 }
 0x4ab   : > { %v1848_v63 = vpop.eup %1847 }
 0x4ac   : > { %899 = vrot.lane.b32.xlu0 %v1848_v63, %s1894_s25 }
 0x4af   : > { %v1850_v0 = vpop.eup %1849 }
 0x4b0   : > { %1002 = vrot.lane.b32.xlu1 %v1850_v0, %s1894_s25 }
 0x51e   : > { %v900_v4 = vpop.permute.xlu0 %899 }
 0x51f   : > { %v2102_v6 = vmul.f32 %v1844_v49, %v900_v4 }
 0x521   : > { %909 = vrot.lane.b32.xlu0 %v2102_v6, %s1895_s20 }
 0x522   : > { %v1003_v7 = vpop.permute.xlu1 %1002 }
 0x523   : > { %v2107_v8 = vmul.f32 %v1846_v52, %v1003_v7 }
 0x525   : > { %1012 = vrot.lane.b32.xlu1 %v2107_v8, %s1895_s20  ;;  %904 = vrot.lane.b32.xlu0 %v896_v59, %s1896_s17  ;;  %v1816_v59 = vld [vmem:[%s2227_s7 + $0x8] sm:$0xff]  }
 0x529   : > { %1007 = vrot.lane.b32.xlu1 %v999_v62, %s1896_s17  ;;  %v1818_v62 = vld [vmem:[%s2227_s7] sm:$0xff]  }
 0x593   : > { %v910_v10 = vpop.permute.xlu0 %909 }
 0x594   : > { %912 = vst.msk [vmem:[#allocation4] sm:$0xff] %vm431_vm1, %v910_v10 }
 0x597   : > { %v1013_v11 = vpop.permute.xlu1 %1012  ;;  %v905_v12 = vpop.permute.xlu0 %904 }
 0x598   : > { %1015 = vst.msk [vmem:[#allocation6] sm:$0xff] %vm431_vm1, %v1013_v11  ;;  %907 = vst.msk [vmem:[#allocation5] sm:$0xff] %vm431_vm1, %v905_v12 }
 0x59b   : > { %v1008_v13 = vpop.permute.xlu1 %1007  ;;  %v1036_v15 = vld [vmem:[#allocation4] sm:$0xff] }
 0x59c   : > { %1010 = vst.msk [vmem:[#allocation7] sm:$0xff] %vm431_vm1, %v1008_v13  ;;  %v1037_v17 = vpack.c.bf16 %v1036_v15, %v1036_v15 }
 0x59e   : > { %1754 = vmatmul.mubr.msk.bf16.vlgmr.msra.gmra.mxu0 %vm431_vm1, %v1037_v17 }
 0x59f   : > { %v1139_v18 = vld [vmem:[#allocation6] sm:$0xff]  ;;  %1769 = vmatprep.mubr.msk.bf16.mxu0 %vm1893_vm2, %v1892_v9  ;;  %v1105_v38 = vld [vmem:[#allocation5] sm:$0xff]  ;;  %1766 = vmatpush3.bf16.msra.mxu0 %v1815_v58 }
 0x5a0   : > { %v1140_v19 = vpack.c.bf16 %v1139_v18, %v1139_v18  ;;  %1767 = vmatprep.subr.bf16.mxu0 %v1892_v9 }
 0x5a2   : > { %1762 = vmatmul.mubr.msk.bf16.vlgmr.msra.gmra.mxu1 %vm431_vm1, %v1140_v19 }
 0x5a3   : > { %1777 = vmatprep.mubr.msk.bf16.mxu1 %vm1893_vm2, %v1892_v9  ;;  %1774 = vmatpush3.bf16.msra.mxu1 %v1816_v59 }
 0x5a4   : > { %1775 = vmatprep.subr.bf16.mxu1 %v1892_v9  ;;  %1768 = vmatpush3.bf16.msra.mxu0 %v1817_v60 }
 0x5a7   : > { %1776 = vmatpush3.bf16.msra.mxu1 %v1818_v62 }
 0x65e   : > { %v1091_v20 = vpop.f32.mrf.mxu0 }
 0x65f   : > { %v1097_v21 = vadd.f32 %v1091_v20, %v2023_v23  ;;  %v1208_v23 = vld [vmem:[#allocation7] sm:$0xff] }
 0x660   : > { %v1755_v22 = vpop.f32.mrf.mxu0 }
 0x661   : > { %1851 = vtanh.f32 %v1097_v21  ;;  %v1639_v39 = vmul.f32 -1.442695, %v1097_v21 }
 0x662   : > { %v1094_v24 = vpop.f32.mrf.mxu0  ;;  %v1194_v26 = vpop.f32.mrf.mxu1 }
 0x663   : > { %v1200_v27 = vadd.f32 %v1194_v26, %v2033_v36 }
 0x664   : > { %v1756_v29 = vpop.f32.mrf.mxu0  ;;  %v1763_v31 = vpop.f32.mrf.mxu1 }
 0x665   : > { %1853 = vtanh.f32 %v1200_v27  ;;  %v1643_v36 = vmul.f32 -1.442695, %v1200_v27 }
 0x666   : > { %v1197_v32 = vpop.f32.mrf.mxu1  ;;  %1855 = vpow2.f32 %v1639_v39 }
 0x667   : > { %1857 = vpow2.f32 %v1643_v36 }
 0x668   : > { %v1764_v33 = vpop.f32.mrf.mxu1 }
 0x66e   : > { %v1852_v35 = vpop.eup %1851 }
 0x66f   : > { %1112 = vrot.lane.b32.xlu0 %v1852_v35, %s1894_s25 }
 0x672   : > { %v1854_v37 = vpop.eup %1853 }
 0x673   : > { %1215 = vrot.lane.b32.xlu1 %v1854_v37, %s1894_s25  ;;  %1107 = vrot.lane.b32.xlu0 %v1105_v38, %s1894_s25  ;;  %v1856_v40 = vpop.eup %1855 }
 0x674   : > { %v1101_v41 = vadd.f32 1.0, %v1856_v40  ;;  %v1858_v42 = vpop.eup %1857 }
 0x675   : > { %v1204_v43 = vadd.f32 1.0, %v1858_v42 }
 0x676   : > { %1859 = vrcp.f32 %v1101_v41 }
 0x677   : > { %1210 = vrot.lane.b32.xlu1 %v1208_v23, %s1894_s25  ;;  %1861 = vrcp.f32 %v1204_v43 }
 0x683   : > { %v1860_v34 = vpop.eup %1859 }
 0x684   : > { %v1862_v45 = vpop.eup %1861 }
 0x6e1   : > { %v1113_v44 = vpop.permute.xlu0 %1112 }
 0x6e2   : > { %v1115_v25 = vmul.f32 %v1860_v34, %v1113_v44 }
 0x6e4   : > { %1117 = vrot.lane.b32.xlu0 %v1115_v25, %s1894_s25 }
 0x6e5   : > { %v1216_v46 = vpop.permute.xlu1 %1215  ;;  %v1108_v48 = vpop.permute.xlu0 %1107 }
 0x6e6   : > { %v1218_v47 = vmul.f32 %v1862_v45, %v1216_v46  ;;  %v1110_v49 = vmul.f32 %v1860_v34, %v1108_v48 }
 0x6e8   : > { %1220 = vrot.lane.b32.xlu1 %v1218_v47, %s1894_s25 }
 0x6e9   : > { %v1211_v50 = vpop.permute.xlu1 %1210 }
 0x6ea   : > { %v1213_v53 = vmul.f32 %v1862_v45, %v1211_v50 }
 0x756   : > { %v1118_v51 = vpop.permute.xlu0 %1117 }
 0x757   : > { %v1120_v52 = vadd.f32 %v1118_v51, %v1110_v49  ;;  %v1661_v49 = vpack.c.bf16 %v2056_v14, %v2056_v14  ;;  %v1662_v51 = vpack.c.bf16 %v2061_v16, %v2061_v16 }
 0x759   : > { %1863 = vtanh.f32 %v1120_v52 }
 0x75a   : > { %v1221_v54 = vpop.permute.xlu1 %1220 }
 0x75b   : > { %v1223_v55 = vadd.f32 %v1221_v54, %v1213_v53  ;;  %v1664_v53 = vpack.c.bf16 %v2107_v8, %v2107_v8 }
 0x75d   : > { %1865 = vtanh.f32 %v1223_v55 }
 0x766   : > { %v1864_v56 = vpop.eup %1863 }
 0x767   : > { %1123 = vrot.lane.b32.xlu0 %v1864_v56, %s1894_s25 }
 0x76a   : > { %v1866_v57 = vpop.eup %1865 }
 0x76b   : > { %1226 = vrot.lane.b32.xlu1 %v1866_v57, %s1894_s25 }
 0x7d9   : > { %v1124_v61 = vpop.permute.xlu0 %1123 }
 0x7da   : > { %v2147_v63 = vmul.f32 %v1860_v34, %v1124_v61 }
 0x7dc   : > { %1133 = vrot.lane.b32.xlu0 %v2147_v63, %s1895_s20  ;;  %v1665_v14 = vpack.c.bf16 %v2147_v63, %v2147_v63 }
 0x7dd   : > { %v1227_v0 = vpop.permute.xlu1 %1226 }
 0x7de   : > { %v2151_v1 = vmul.f32 %v1862_v45, %v1227_v0 }
 0x7e0   : > { %1236 = vrot.lane.b32.xlu1 %v2151_v1, %s1895_s20  ;;  %1128 = vrot.lane.b32.xlu0 %v1120_v52, %s1896_s17  ;;  %v1663_v52 = vpack.c.bf16 %v2102_v6, %v2102_v6  ;;  %v1666_v16 = vpack.c.bf16 %v2151_v1, %v2151_v1 }
 0x7e4   : > { %1231 = vrot.lane.b32.xlu1 %v1223_v55, %s1896_s17 }
 0x84e   : > { %v1134_v9 = vpop.permute.xlu0 %1133 }
 0x84f   : > { %1136 = vst.msk [vmem:[#allocation4] sm:$0xff] %vm431_vm1, %v1134_v9 }
 0x852   : > { %v1237_v2 = vpop.permute.xlu1 %1236  ;;  %v1129_v3 = vpop.permute.xlu0 %1128 }
 0x853   : > { %1239 = vst.msk [vmem:[#allocation6] sm:$0xff] %vm431_vm1, %v1237_v2  ;;  %1131 = vst.msk [vmem:[#allocation5] sm:$0xff] %vm431_vm1, %v1129_v3 }
 0x856   : > { %v1232_v4 = vpop.permute.xlu1 %1231  ;;  %v1260_v5 = vld [vmem:[#allocation4] sm:$0xff] }
 0x857   : > { %1234 = vst.msk [vmem:[#allocation7] sm:$0xff] %vm431_vm1, %v1232_v4  ;;  %v1261_v7 = vpack.c.bf16 %v1260_v5, %v1260_v5 }
 0x859   : > { %1770 = vmatmul.mubr.msk.bf16.vlgmr.msra.gmra.mxu0 %vm431_vm1, %v1261_v7 }
 0x85a   : > { %v1362_v10 = vld [vmem:[#allocation6] sm:$0xff]  ;;  %v1329_v29 = vld [vmem:[#allocation5] sm:$0xff] }
 0x85b   : > { %v1363_v11 = vpack.c.bf16 %v1362_v10, %v1362_v10 }
 0x85d   : > { %1778 = vmatmul.mubr.msk.bf16.vlgmr.msra.gmra.mxu1 %vm431_vm1, %v1363_v11 }
 0x919   : > { %v1315_v12 = vpop.f32.mrf.mxu0 }
 0x91a   : > { %v1321_v13 = vadd.f32 %v1315_v12, %v2029_v30  ;;  %v1431_v30 = vld [vmem:[#allocation7] sm:$0xff] }
 0x91b   : > { %v1771_v15 = vpop.f32.mrf.mxu0 }
 0x91c   : > { %1867 = vtanh.f32 %v1321_v13  ;;  %v1651_v31 = vmul.f32 -1.442695, %v1321_v13 }
 0x91d   : > { %v1318_v17 = vpop.f32.mrf.mxu0  ;;  %v1417_v18 = vpop.f32.mrf.mxu1 }
 0x91e   : > { %v1423_v19 = vadd.f32 %v1417_v18, %v2027_v28 }
 0x91f   : > { %v1772_v20 = vpop.f32.mrf.mxu0  ;;  %v1779_v21 = vpop.f32.mrf.mxu1 }
 0x920   : > { %1869 = vtanh.f32 %v1423_v19  ;;  %v1655_v28 = vmul.f32 -1.442695, %v1423_v19 }
 0x921   : > { %v1420_v22 = vpop.f32.mrf.mxu1  ;;  %1871 = vpow2.f32 %v1651_v31 }
 0x922   : > { %1873 = vpow2.f32 %v1655_v28 }
 0x923   : > { %v1780_v24 = vpop.f32.mrf.mxu1 }
 0x929   : > { %v1868_v26 = vpop.eup %1867 }
 0x92a   : > { %1336 = vrot.lane.b32.xlu0 %v1868_v26, %s1894_s25 }
 0x92d   : > { %v1870_v27 = vpop.eup %1869 }
 0x92e   : > { %1438 = vrot.lane.b32.xlu1 %v1870_v27, %s1894_s25  ;;  %1331 = vrot.lane.b32.xlu0 %v1329_v29, %s1894_s25  ;;  %v1872_v32 = vpop.eup %1871 }
 0x92f   : > { %v1325_v33 = vadd.f32 1.0, %v1872_v32  ;;  %v1874_v35 = vpop.eup %1873 }
 0x930   : > { %v1427_v37 = vadd.f32 1.0, %v1874_v35 }
 0x931   : > { %1875 = vrcp.f32 %v1325_v33 }
 0x932   : > { %1433 = vrot.lane.b32.xlu1 %v1431_v30, %s1894_s25  ;;  %1877 = vrcp.f32 %v1427_v37 }
 0x93e   : > { %v1876_v38 = vpop.eup %1875 }
 0x93f   : > { %v1878_v36 = vpop.eup %1877 }
 0x99c   : > { %v1337_v23 = vpop.permute.xlu0 %1336 }
 0x99d   : > { %v1339_v39 = vmul.f32 %v1876_v38, %v1337_v23 }
 0x99f   : > { %1341 = vrot.lane.b32.xlu0 %v1339_v39, %s1894_s25 }
 0x9a0   : > { %v1439_v40 = vpop.permute.xlu1 %1438  ;;  %v1332_v42 = vpop.permute.xlu0 %1331 }
 0x9a1   : > { %v1441_v41 = vmul.f32 %v1878_v36, %v1439_v40  ;;  %v1334_v43 = vmul.f32 %v1876_v38, %v1332_v42 }
 0x9a3   : > { %1443 = vrot.lane.b32.xlu1 %v1441_v41, %s1894_s25 }
 0x9a4   : > { %v1434_v34 = vpop.permute.xlu1 %1433 }
 0x9a5   : > { %v1436_v45 = vmul.f32 %v1878_v36, %v1434_v34 }
 0xa11   : > { %v1342_v44 = vpop.permute.xlu0 %1341 }
 0xa12   : > { %v1344_v25 = vadd.f32 %v1342_v44, %v1334_v43 }
 0xa14   : > { %1879 = vtanh.f32 %v1344_v25 }
 0xa15   : > { %v1444_v46 = vpop.permute.xlu1 %1443 }
 0xa16   : > { %v1446_v47 = vadd.f32 %v1444_v46, %v1436_v45 }
 0xa18   : > { %1881 = vtanh.f32 %v1446_v47 }
 0xa21   : > { %v1880_v48 = vpop.eup %1879 }
 0xa22   : > { %1347 = vrot.lane.b32.xlu0 %v1880_v48, %s1894_s25 }
 0xa25   : > { %v1882_v50 = vpop.eup %1881 }
 0xa26   : > { %1449 = vrot.lane.b32.xlu1 %v1882_v50, %s1894_s25  ;;  %796 = vrot.lane.b32.xlu0 %v1661_v49, %s1895_s20 }
 0xa2a   : > { %805 = vrot.lane.b32.xlu1 %v1662_v51, %s1895_s20  ;;  %1020 = vrot.lane.b32.xlu0 %v1663_v52, %s1895_s20 }
 0xa2e   : > { %1029 = vrot.lane.b32.xlu1 %v1664_v53, %s1895_s20  ;;  %1244 = vrot.lane.b32.xlu0 %v1665_v14, %s1895_s20 }
 0xa32   : > { %1253 = vrot.lane.b32.xlu1 %v1666_v16, %s1895_s20  ;;  %1352 = vrot.lane.b32.xlu0 %v1344_v25, %s1896_s17 }
 0xa36   : > { %1454 = vrot.lane.b32.xlu0 %v1446_v47, %s1896_s17 }
 0xa94   : > { %v1348_v6 = vpop.permute.xlu0 %1347 }
 0xa95   : > { %v1350_v8 = vmul.f32 %v1876_v38, %v1348_v6 }
 0xa97   : > { %v1667_v54 = vpack.c.bf16 %v1350_v8, %v1350_v8  ;;  %1357 = vrot.lane.b32.xlu1 %v1350_v8, %s1895_s20 }
 0xa98   : > { %v1450_v55 = vpop.permute.xlu1 %1449  ;;  %v797_v56 = vpop.permute.xlu0 %796 }
 0xa99   : > { %v1452_v57 = vmul.f32 %v1878_v36, %v1450_v55  ;;  %800 = vst.msk [vmem:[%s1964_s24] sm:$0xf] %vm799_vm3, %v797_v56  ;;  %1467 = vrot.lane.b32.xlu0 %v1667_v54, %s1895_s20 }
 0xa9b   : > { %1459 = vrot.lane.b32.xlu1 %v1452_v57, %s1895_s20  ;;  %v1668_v60 = vpack.c.bf16 %v1452_v57, %v1452_v57 }
 0xa9c   : > { %v806_v58 = vpop.permute.xlu1 %805  ;;  %v1021_v59 = vpop.permute.xlu0 %1020 }
 0xa9d   : > { %1623 = vst.msk [vmem:[%s1969_s27 + $0xc] sm:$0xf] %vm799_vm3, %v806_v58  ;;  %1633 = vst.msk [vmem:[%s1964_s24 + $0x4] sm:$0xf] %vm799_vm3, %v1021_v59 }
 0xa9f   : > { %1476 = vrot.lane.b32.xlu1 %v1668_v60, %s1895_s20 }
 0xaa0   : > { %v1030_v61 = vpop.permute.xlu1 %1029  ;;  %v1245_v62 = vpop.permute.xlu0 %1244 }
 0xaa1   : > { %1635 = vst.msk [vmem:[%s1969_s27 + $0x8] sm:$0xf] %vm799_vm3, %v1030_v61  ;;  %1645 = vst.msk [vmem:[%s1964_s24 + $0x8] sm:$0xf] %vm799_vm3, %v1245_v62 }
 0xaa4   : > { %v1254_v63 = vpop.permute.xlu1 %1253  ;;  %v1353_v0 = vpop.permute.xlu0 %1352 }
 0xaa5   : > { %1647 = vst.msk [vmem:[%s1969_s27 + $0x4] sm:$0xf] %vm799_vm3, %v1254_v63 }
 0xaa6   : > { %1355 = vst.msk [vmem:[#allocation5] sm:$0xff] %vm431_vm1, %v1353_v0 }
 0xaa8   : > { %v1455_v1 = vpop.permute.xlu0 %1454 }
 0xaa9   : > { %1457 = vst.msk [vmem:[#allocation7] sm:$0xff] %vm431_vm1, %v1455_v1 }
 0xb09   : > { %v1358_v9 = vpop.permute.xlu1 %1357 }
 0xb0a   : > { %1360 = vst.msk [vmem:[#allocation4] sm:$0xff] %vm431_vm1, %v1358_v9 }
 0xb0b   : > { %v1468_v2 = vpop.permute.xlu0 %1467 }
 0xb0c   : > { %1657 = vst.msk [vmem:[%s1964_s24 + $0xc] sm:$0xf] %vm799_vm3, %v1468_v2 }
 0xb0d   : > { %v1460_v3 = vpop.permute.xlu1 %1459 }
 0xb0e   : > { %1462 = vst.msk [vmem:[#allocation6] sm:$0xff] %vm431_vm1, %v1460_v3 }
 0xb11   : > { %v1477_v4 = vpop.permute.xlu1 %1476 }
 0xb12   : > { %1479 = vst.msk [vmem:[%s1969_s27] sm:$0xf] %vm799_vm3, %v1477_v4 }
 0xb13 PF: > { %s20_s30 = sadd.s32 1, %s1889_s30  }
 0xb14   : > { %p17_p6 = scmp.ge.s32.totalorder %s20_s30, 4  }
 0xb16   :  { %19 = sbr.rel (!%p17_p6) target bundleno = 1 (0x1), region = 113 }

</bundles_post_ra>
